<compile_context>
chip_gen: v7x
topology: tpu7x:2x2x1
jax: 0.10.0
libtpu: 0.0.40
codegen_flags: <defaults>
</compile_context>

<pallas_src>
import numpy as np

import jax
import jax.numpy as jnp
from jax.experimental import pallas as pl
from jax.experimental.pallas import tpu as pltpu


# ---------------------------- fused Pallas kernel ----------------------------

def _make_lenet5_kernel(B):
    """Build the fused kernel for a static batch size B.

    Layouts (all 2-D, rows in sublanes / cols in lanes):
      x_ref   : (32B, 32)   padded input rows, row = (i%4)*8*B + (i//4)*B + b
      t1_ref  : (5, 32, 168) conv1 Toeplitz rhs per h-tap ki,
                             cols = (pool_pj, w1_parity, w1_coarse, cout6)
      t2_ref  : (5, 84, 160) conv2 Toeplitz rhs per h-tap ki,
                             in cols = (w1_parity, w1_coarse, c6),
                             out cols = (pool_pj2, w2, cout16)
      wsel_ref: (5, 80, 10)  folded FC weights, regrouped per h2 row-block
      o_ref   : (B, 10)
    """

    def kernel(x_ref, t1_ref, b1_ref, t2_ref, b2_ref, wsel_ref, bf_ref, o_ref):
        # ---------------- conv1 (1->6, k5, pad2) + ReLU + 2x2 maxpool ---------
        # y1 is kept as two blocks (one per h1-parity a1), each (7B, 84) with
        # rows = (h1//2, b) and cols = (w1 parity, w1//2, channel).
        b1t = b1_ref[...]                                    # (1, 168)
        y1 = [None, None]
        for a1 in range(2):                                  # h1 parity of y1
            zmax = None
            for pi in range(2):                              # pool offset (rows)
                acc = jnp.zeros((7 * B, 168), jnp.float32)
                for ki in range(5):                          # conv h-taps
                    s = 2 * a1 + pi + ki                     # input row offset
                    r0 = ((s % 4) * 8 + s // 4) * B          # mod-4 phase layout
                    lhs = x_ref[pl.ds(r0, 7 * B), :]         # (7B, 32)
                    acc = acc + jnp.dot(lhs, t1_ref[ki],
                                        preferred_element_type=jnp.float32)
                z = jnp.maximum(acc + b1t, 0.0)              # bias + ReLU
                zp = jnp.maximum(z[:, :84], z[:, 84:])       # pool over w offset
                zmax = zp if zmax is None else jnp.maximum(zmax, zp)  # pool h
            y1[a1] = zmax                                    # (7B, 84)

        # ---------------- conv2 (6->16, k5) + ReLU + 2x2 maxpool --------------
        # y2: (5B, 80), rows = (h2, b), cols = (w2, out_channel).
        b2t = b2_ref[...]                                    # (1, 160)
        y2 = None
        for pi2 in range(2):                                 # pool offset (rows)
            acc = jnp.zeros((5 * B, 160), jnp.float32)
            for ki in range(5):                              # conv h-taps
                a1 = (pi2 + ki) % 2                          # which y1 block
                dh = (pi2 + ki) // 2                         # coarse row shift
                lhs = y1[a1][dh * B:(dh + 5) * B, :]         # (5B, 84)
                acc = acc + jnp.dot(lhs, t2_ref[ki],
                                    preferred_element_type=jnp.float32)
            z = jnp.maximum(acc + b2t, 0.0)                  # bias + ReLU
            zp = jnp.maximum(z[:, :80], z[:, 80:])           # pool over w offset
            y2 = zp if y2 is None else jnp.maximum(y2, zp)   # pool over h offset

        # ---------------- folded Linear 400->120->84->10 ----------------------
        # One precomputed (400,10) matrix, applied as 5 row-block matmuls so the
        # NCHW flatten never needs an in-kernel transpose.
        acc = jnp.zeros((B, 10), jnp.float32)
        for h2 in range(5):
            acc = acc + jnp.dot(y2[h2 * B:(h2 + 1) * B, :], wsel_ref[h2],
                                preferred_element_type=jnp.float32)
        o_ref[...] = acc + bf_ref[...]

    return kernel


# ------------------------------- host-side prep ------------------------------

def _conv1_toeplitz(w1):
    """T1[ki]: (32, 168); cols = ((pj*2 + wpar)*7 + wcoarse)*6 + c."""
    P1 = np.zeros((5, 32, 28), np.float32)       # (kj, input col j, col base)
    for pj in range(2):
        for bp in range(2):
            for ww in range(7):
                base = (pj * 2 + bp) * 7 + ww
                j1 = 4 * ww + 2 * bp + pj        # pre-pool output column
                for kj in range(5):
                    P1[kj, j1 + kj, base] = 1.0
    t1 = jnp.einsum('kjb,qkc->qjbc', jnp.asarray(P1), w1[:, :, 0, :])
    return t1.reshape(5, 32, 28 * 6)


def _conv2_toeplitz(w2):
    """T2[ki]: (84, 160); in cols = (wpar*7 + wcoarse)*6 + c,
    out cols = (pj2*5 + w2)*16 + oc."""
    P2 = np.zeros((5, 14, 10), np.float32)       # (kj, in base, out base)
    for pj2 in range(2):
        for w2o in range(5):
            ob = pj2 * 5 + w2o
            for kj in range(5):
                bp = (pj2 + kj) % 2
                ww = w2o + (pj2 + kj) // 2
                P2[kj, bp * 7 + ww, ob] = 1.0
    t2 = jnp.einsum('kio,qkcd->qicod', jnp.asarray(P2), w2)
    return t2.reshape(5, 14 * 6, 10 * 16)


def lenet5_forward(x_nchw, params):
    (w1, b1, w2, b2, wf1, bf1, wf2, bf2, wf3, bf3) = params
    B = x_nchw.shape[0]

    # Input: NCHW -> pad 2 -> mod-4 row-phase layout (32B, 32).
    x = x_nchw[:, 0]                                        # (B, 28, 28)
    xp = jnp.pad(x, ((0, 0), (2, 2), (2, 2)))               # (B, 32, 32)
    xq = xp.reshape(B, 8, 4, 32)                            # row i = 4q + r4
    x2d = jnp.transpose(xq, (2, 1, 0, 3)).reshape(32 * B, 32)

    # Conv weights as Toeplitz rhs; biases tiled to the column layouts.
    t1 = _conv1_toeplitz(w1)                                # (5, 32, 168)
    b1t = jnp.tile(b1, (1, 28))                             # (1, 168)
    t2 = _conv2_toeplitz(w2)                                # (5, 84, 160)
    b2t = jnp.tile(b2, (1, 10))                             # (1, 160)

    # Fold the activation-free Linear stack into one matmul + bias, then
    # regroup rows from PyTorch NCHW-flatten order (oc,h2,w2) to per-h2
    # blocks with (w2, oc) columns (the kernel's y2 layout).
    wfold = wf1 @ wf2 @ wf3                                 # (400, 10)
    bfold = (bf1 @ wf2 + bf2) @ wf3 + bf3                   # (1, 10)
    wsel = jnp.transpose(wfold.reshape(16, 5, 5, 10), (1, 2, 0, 3))
    wsel = wsel.reshape(5, 80, 10)

    kernel = _make_lenet5_kernel(B)
    return pl.pallas_call(
        kernel,
        out_shape=jax.ShapeDtypeStruct((B, 10), jnp.float32),
        grid=(1,),
        in_specs=[
            pl.BlockSpec((32 * B, 32), lambda i: (0, 0)),
            pl.BlockSpec((5, 32, 168), lambda i: (0, 0, 0)),
            pl.BlockSpec((1, 168), lambda i: (0, 0)),
            pl.BlockSpec((5, 84, 160), lambda i: (0, 0, 0)),
            pl.BlockSpec((1, 160), lambda i: (0, 0)),
            pl.BlockSpec((5, 80, 10), lambda i: (0, 0, 0)),
            pl.BlockSpec((1, 10), lambda i: (0, 0)),
        ],
        out_specs=pl.BlockSpec((B, 10), lambda i: (0, 0)),
        compiler_params=pltpu.CompilerParams(
            dimension_semantics=("arbitrary",)),
    )(x2d, t1, b1t, t2, b2t, wsel, bfold)


# ----------------------------- pure-JAX reference ----------------------------

def lenet5_reference(x_nchw, params):
    (w1, b1, w2, b2, wf1, bf1, wf2, bf2, wf3, bf3) = params
    dn = ('NHWC', 'HWIO', 'NHWC')
    x = jnp.transpose(x_nchw, (0, 2, 3, 1))
    y = jax.lax.conv_general_dilated(x, w1, (1, 1), ((2, 2), (2, 2)),
                                     dimension_numbers=dn)
    y = jax.nn.relu(y + b1.reshape(1, 1, 1, -1))
    y = jax.lax.reduce_window(y, -jnp.inf, jax.lax.max,
                              (1, 2, 2, 1), (1, 2, 2, 1), 'VALID')
    y = jax.lax.conv_general_dilated(y, w2, (1, 1), ((0, 0), (0, 0)),
                                     dimension_numbers=dn)
    y = jax.nn.relu(y + b2.reshape(1, 1, 1, -1))
    y = jax.lax.reduce_window(y, -jnp.inf, jax.lax.max,
                              (1, 2, 2, 1), (1, 2, 2, 1), 'VALID')
    feat = jnp.transpose(y, (0, 3, 1, 2)).reshape(x.shape[0], -1)   # NCHW flatten
    h = feat @ wf1 + bf1
    h = h @ wf2 + bf2
    return h @ wf3 + bf3


# ------------------------------------ main ------------------------------------

if __name__ == "__main__":
    key = jax.random.PRNGKey(0)
    ks = jax.random.split(key, 11)

    # deterministic synthetic parameters (shapes dictated by the torch module)
    w1 = jax.random.normal(ks[0], (5, 5, 1, 6), jnp.float32) * 0.20    # HWIO
    b1 = jax.random.normal(ks[1], (1, 6), jnp.float32) * 0.10
    w2 = jax.random.normal(ks[2], (5, 5, 6, 16), jnp.float32) * 0.08   # HWIO
    b2 = jax.random.normal(ks[3], (1, 16), jnp.float32) * 0.10
    wf1 = jax.random.normal(ks[4], (400, 120), jnp.float32) * 0.05
    bf1 = jax.random.normal(ks[5], (1, 120), jnp.float32) * 0.10
    wf2 = jax.random.normal(ks[6], (120, 84), jnp.float32) * 0.09
    bf2 = jax.random.normal(ks[7], (1, 84), jnp.float32) * 0.10
    wf3 = jax.random.normal(ks[8], (84, 10), jnp.float32) * 0.10
    bf3 = jax.random.normal(ks[9], (1, 10), jnp.float32) * 0.10
    params = (w1, b1, w2, b2, wf1, bf1, wf2, bf2, wf3, bf3)

    # LeNet5 requires 1x28x28 inputs (so .view(-1, 16*5*5) works); batch=2.
    x = jax.random.normal(ks[10], (2, 1, 28, 28), jnp.float32)

    fwd = jax.jit(lenet5_forward)
    out = jax.block_until_ready(fwd(x, params))
    ref = jax.block_until_ready(lenet5_reference(x, params))

    assert out.shape == (2, 10), out.shape
    out_np, ref_np = np.asarray(out), np.asarray(ref)
    if not np.allclose(out_np, ref_np, rtol=2e-3, atol=2e-3):
        raise AssertionError(
            f"mismatch vs reference: max abs diff {np.max(np.abs(out_np - ref_np))}")
    print("KERNEL_OK")
</pallas_src>

<mosaic_0001>
module attributes {stable_mosaic.version = 11 : i64} {
  func.func @kernel(%arg0: i32, %arg1: memref<64x32xf32, #tpu.memory_space<vmem>>, %arg2: memref<5x32x168xf32, #tpu.memory_space<vmem>>, %arg3: memref<1x168xf32, #tpu.memory_space<vmem>>, %arg4: memref<5x84x160xf32, #tpu.memory_space<vmem>>, %arg5: memref<1x160xf32, #tpu.memory_space<vmem>>, %arg6: memref<5x80x10xf32, #tpu.memory_space<vmem>>, %arg7: memref<1x10xf32, #tpu.memory_space<vmem>>, %arg8: memref<2x10xf32, #tpu.memory_space<vmem>>) attributes {dimension_semantics = [#tpu.dimension_semantics<arbitrary>], iteration_bounds = array<i64: 1>, scalar_prefetch = 0 : i64, scratch_operands = 0 : i64, tpu.core_type = #tpu.core_type<tc>, window_params = [{pipeline_mode = #tpu.pipeline_mode<synchronous>, transform_indices = @transform_0, window_bounds = array<i64: 64, 32>}, {pipeline_mode = #tpu.pipeline_mode<synchronous>, transform_indices = @transform_1, window_bounds = array<i64: 5, 32, 168>}, {pipeline_mode = #tpu.pipeline_mode<synchronous>, transform_indices = @transform_2, window_bounds = array<i64: 1, 168>}, {pipeline_mode = #tpu.pipeline_mode<synchronous>, transform_indices = @transform_3, window_bounds = array<i64: 5, 84, 160>}, {pipeline_mode = #tpu.pipeline_mode<synchronous>, transform_indices = @transform_4, window_bounds = array<i64: 1, 160>}, {pipeline_mode = #tpu.pipeline_mode<synchronous>, transform_indices = @transform_5, window_bounds = array<i64: 5, 80, 10>}, {pipeline_mode = #tpu.pipeline_mode<synchronous>, transform_indices = @transform_6, window_bounds = array<i64: 1, 10>}, {pipeline_mode = #tpu.pipeline_mode<synchronous>, transform_indices = @transform_7, window_bounds = array<i64: 2, 10>}]} {
    %c0 = arith.constant 0 : index
    %c0_0 = arith.constant 0 : index
    %0 = vector.load %arg3[%c0, %c0_0] : memref<1x168xf32, #tpu.memory_space<vmem>>, vector<1x168xf32>
    %cst = arith.constant 0.000000e+00 : f32
    %1 = vector.broadcast %cst : f32 to vector<14x168xf32>
    %c0_1 = arith.constant 0 : index
    %c0_2 = arith.constant 0 : index
    %2 = vector.load %arg1[%c0_1, %c0_2] : memref<64x32xf32, #tpu.memory_space<vmem>>, vector<14x32xf32>
    %c0_3 = arith.constant 0 : index
    %c0_4 = arith.constant 0 : index
    %c0_5 = arith.constant 0 : index
    %3 = vector.load %arg2[%c0_3, %c0_4, %c0_5] : memref<5x32x168xf32, #tpu.memory_space<vmem>>, vector<1x32x168xf32>
    %4 = vector.shape_cast %3 : vector<1x32x168xf32> to vector<32x168xf32>
    %cst_6 = arith.constant dense<0.000000e+00> : vector<14x168xf32>
    %5 = tpu.matmul %2, %4, %cst_6 {dimension_numbers = #tpu.dot_dimension_numbers<[1], [0], [0], [1], [0, 0, 1, 1], [], []>} : vector<14x32xf32>, vector<32x168xf32>, vector<14x168xf32> -> vector<14x168xf32>
    %6 = arith.addf %1, %5 : vector<14x168xf32>
    %c16 = arith.constant 16 : index
    %c0_7 = arith.constant 0 : index
    %7 = vector.load %arg1[%c16, %c0_7] : memref<64x32xf32, #tpu.memory_space<vmem>>, vector<14x32xf32>
    %c1 = arith.constant 1 : index
    %c0_8 = arith.constant 0 : index
    %c0_9 = arith.constant 0 : index
    %8 = vector.load %arg2[%c1, %c0_8, %c0_9] : memref<5x32x168xf32, #tpu.memory_space<vmem>>, vector<1x32x168xf32>
    %9 = vector.shape_cast %8 : vector<1x32x168xf32> to vector<32x168xf32>
    %cst_10 = arith.constant dense<0.000000e+00> : vector<14x168xf32>
    %10 = tpu.matmul %7, %9, %cst_10 {dimension_numbers = #tpu.dot_dimension_numbers<[1], [0], [0], [1], [0, 0, 1, 1], [], []>} : vector<14x32xf32>, vector<32x168xf32>, vector<14x168xf32> -> vector<14x168xf32>
    %11 = arith.addf %6, %10 : vector<14x168xf32>
    %c32 = arith.constant 32 : index
    %c0_11 = arith.constant 0 : index
    %12 = vector.load %arg1[%c32, %c0_11] : memref<64x32xf32, #tpu.memory_space<vmem>>, vector<14x32xf32>
    %c2 = arith.constant 2 : index
    %c0_12 = arith.constant 0 : index
    %c0_13 = arith.constant 0 : index
    %13 = vector.load %arg2[%c2, %c0_12, %c0_13] : memref<5x32x168xf32, #tpu.memory_space<vmem>>, vector<1x32x168xf32>
    %14 = vector.shape_cast %13 : vector<1x32x168xf32> to vector<32x168xf32>
    %cst_14 = arith.constant dense<0.000000e+00> : vector<14x168xf32>
    %15 = tpu.matmul %12, %14, %cst_14 {dimension_numbers = #tpu.dot_dimension_numbers<[1], [0], [0], [1], [0, 0, 1, 1], [], []>} : vector<14x32xf32>, vector<32x168xf32>, vector<14x168xf32> -> vector<14x168xf32>
    %16 = arith.addf %11, %15 : vector<14x168xf32>
    %c48 = arith.constant 48 : index
    %c0_15 = arith.constant 0 : index
    %17 = vector.load %arg1[%c48, %c0_15] : memref<64x32xf32, #tpu.memory_space<vmem>>, vector<14x32xf32>
    %c3 = arith.constant 3 : index
    %c0_16 = arith.constant 0 : index
    %c0_17 = arith.constant 0 : index
    %18 = vector.load %arg2[%c3, %c0_16, %c0_17] : memref<5x32x168xf32, #tpu.memory_space<vmem>>, vector<1x32x168xf32>
    %19 = vector.shape_cast %18 : vector<1x32x168xf32> to vector<32x168xf32>
    %cst_18 = arith.constant dense<0.000000e+00> : vector<14x168xf32>
    %20 = tpu.matmul %17, %19, %cst_18 {dimension_numbers = #tpu.dot_dimension_numbers<[1], [0], [0], [1], [0, 0, 1, 1], [], []>} : vector<14x32xf32>, vector<32x168xf32>, vector<14x168xf32> -> vector<14x168xf32>
    %21 = arith.addf %16, %20 : vector<14x168xf32>
    %c2_19 = arith.constant 2 : index
    %c0_20 = arith.constant 0 : index
    %22 = vector.load %arg1[%c2_19, %c0_20] : memref<64x32xf32, #tpu.memory_space<vmem>>, vector<14x32xf32>
    %c4 = arith.constant 4 : index
    %c0_21 = arith.constant 0 : index
    %c0_22 = arith.constant 0 : index
    %23 = vector.load %arg2[%c4, %c0_21, %c0_22] : memref<5x32x168xf32, #tpu.memory_space<vmem>>, vector<1x32x168xf32>
    %24 = vector.shape_cast %23 : vector<1x32x168xf32> to vector<32x168xf32>
    %cst_23 = arith.constant dense<0.000000e+00> : vector<14x168xf32>
    %25 = tpu.matmul %22, %24, %cst_23 {dimension_numbers = #tpu.dot_dimension_numbers<[1], [0], [0], [1], [0, 0, 1, 1], [], []>} : vector<14x32xf32>, vector<32x168xf32>, vector<14x168xf32> -> vector<14x168xf32>
    %26 = arith.addf %21, %25 : vector<14x168xf32>
    %27 = vector.broadcast %0 : vector<1x168xf32> to vector<14x168xf32>
    %28 = arith.addf %26, %27 : vector<14x168xf32>
    %cst_24 = arith.constant 0.000000e+00 : f32
    %29 = vector.broadcast %cst_24 : f32 to vector<14x168xf32>
    %30 = arith.maximumf %28, %29 : vector<14x168xf32>
    %31 = vector.extract_strided_slice %30 {offsets = [0, 0], sizes = [14, 84], strides = [1, 1]} : vector<14x168xf32> to vector<14x84xf32>
    %32 = vector.extract_strided_slice %30 {offsets = [0, 84], sizes = [14, 84], strides = [1, 1]} : vector<14x168xf32> to vector<14x84xf32>
    %33 = arith.maximumf %31, %32 : vector<14x84xf32>
    %cst_25 = arith.constant 0.000000e+00 : f32
    %34 = vector.broadcast %cst_25 : f32 to vector<14x168xf32>
    %c16_26 = arith.constant 16 : index
    %c0_27 = arith.constant 0 : index
    %35 = vector.load %arg1[%c16_26, %c0_27] : memref<64x32xf32, #tpu.memory_space<vmem>>, vector<14x32xf32>
    %c0_28 = arith.constant 0 : index
    %c0_29 = arith.constant 0 : index
    %c0_30 = arith.constant 0 : index
    %36 = vector.load %arg2[%c0_28, %c0_29, %c0_30] : memref<5x32x168xf32, #tpu.memory_space<vmem>>, vector<1x32x168xf32>
    %37 = vector.shape_cast %36 : vector<1x32x168xf32> to vector<32x168xf32>
    %cst_31 = arith.constant dense<0.000000e+00> : vector<14x168xf32>
    %38 = tpu.matmul %35, %37, %cst_31 {dimension_numbers = #tpu.dot_dimension_numbers<[1], [0], [0], [1], [0, 0, 1, 1], [], []>} : vector<14x32xf32>, vector<32x168xf32>, vector<14x168xf32> -> vector<14x168xf32>
    %39 = arith.addf %34, %38 : vector<14x168xf32>
    %c32_32 = arith.constant 32 : index
    %c0_33 = arith.constant 0 : index
    %40 = vector.load %arg1[%c32_32, %c0_33] : memref<64x32xf32, #tpu.memory_space<vmem>>, vector<14x32xf32>
    %c1_34 = arith.constant 1 : index
    %c0_35 = arith.constant 0 : index
    %c0_36 = arith.constant 0 : index
    %41 = vector.load %arg2[%c1_34, %c0_35, %c0_36] : memref<5x32x168xf32, #tpu.memory_space<vmem>>, vector<1x32x168xf32>
    %42 = vector.shape_cast %41 : vector<1x32x168xf32> to vector<32x168xf32>
    %cst_37 = arith.constant dense<0.000000e+00> : vector<14x168xf32>
    %43 = tpu.matmul %40, %42, %cst_37 {dimension_numbers = #tpu.dot_dimension_numbers<[1], [0], [0], [1], [0, 0, 1, 1], [], []>} : vector<14x32xf32>, vector<32x168xf32>, vector<14x168xf32> -> vector<14x168xf32>
    %44 = arith.addf %39, %43 : vector<14x168xf32>
    %c48_38 = arith.constant 48 : index
    %c0_39 = arith.constant 0 : index
    %45 = vector.load %arg1[%c48_38, %c0_39] : memref<64x32xf32, #tpu.memory_space<vmem>>, vector<14x32xf32>
    %c2_40 = arith.constant 2 : index
    %c0_41 = arith.constant 0 : index
    %c0_42 = arith.constant 0 : index
    %46 = vector.load %arg2[%c2_40, %c0_41, %c0_42] : memref<5x32x168xf32, #tpu.memory_space<vmem>>, vector<1x32x168xf32>
    %47 = vector.shape_cast %46 : vector<1x32x168xf32> to vector<32x168xf32>
    %cst_43 = arith.constant dense<0.000000e+00> : vector<14x168xf32>
    %48 = tpu.matmul %45, %47, %cst_43 {dimension_numbers = #tpu.dot_dimension_numbers<[1], [0], [0], [1], [0, 0, 1, 1], [], []>} : vector<14x32xf32>, vector<32x168xf32>, vector<14x168xf32> -> vector<14x168xf32>
    %49 = arith.addf %44, %48 : vector<14x168xf32>
    %c2_44 = arith.constant 2 : index
    %c0_45 = arith.constant 0 : index
    %50 = vector.load %arg1[%c2_44, %c0_45] : memref<64x32xf32, #tpu.memory_space<vmem>>, vector<14x32xf32>
    %c3_46 = arith.constant 3 : index
    %c0_47 = arith.constant 0 : index
    %c0_48 = arith.constant 0 : index
    %51 = vector.load %arg2[%c3_46, %c0_47, %c0_48] : memref<5x32x168xf32, #tpu.memory_space<vmem>>, vector<1x32x168xf32>
    %52 = vector.shape_cast %51 : vector<1x32x168xf32> to vector<32x168xf32>
    %cst_49 = arith.constant dense<0.000000e+00> : vector<14x168xf32>
    %53 = tpu.matmul %50, %52, %cst_49 {dimension_numbers = #tpu.dot_dimension_numbers<[1], [0], [0], [1], [0, 0, 1, 1], [], []>} : vector<14x32xf32>, vector<32x168xf32>, vector<14x168xf32> -> vector<14x168xf32>
    %54 = arith.addf %49, %53 : vector<14x168xf32>
    %c18 = arith.constant 18 : index
    %c0_50 = arith.constant 0 : index
    %55 = vector.load %arg1[%c18, %c0_50] : memref<64x32xf32, #tpu.memory_space<vmem>>, vector<14x32xf32>
    %c4_51 = arith.constant 4 : index
    %c0_52 = arith.constant 0 : index
    %c0_53 = arith.constant 0 : index
    %56 = vector.load %arg2[%c4_51, %c0_52, %c0_53] : memref<5x32x168xf32, #tpu.memory_space<vmem>>, vector<1x32x168xf32>
    %57 = vector.shape_cast %56 : vector<1x32x168xf32> to vector<32x168xf32>
    %cst_54 = arith.constant dense<0.000000e+00> : vector<14x168xf32>
    %58 = tpu.matmul %55, %57, %cst_54 {dimension_numbers = #tpu.dot_dimension_numbers<[1], [0], [0], [1], [0, 0, 1, 1], [], []>} : vector<14x32xf32>, vector<32x168xf32>, vector<14x168xf32> -> vector<14x168xf32>
    %59 = arith.addf %54, %58 : vector<14x168xf32>
    %60 = vector.broadcast %0 : vector<1x168xf32> to vector<14x168xf32>
    %61 = arith.addf %59, %60 : vector<14x168xf32>
    %cst_55 = arith.constant 0.000000e+00 : f32
    %62 = vector.broadcast %cst_55 : f32 to vector<14x168xf32>
    %63 = arith.maximumf %61, %62 : vector<14x168xf32>
    %64 = vector.extract_strided_slice %63 {offsets = [0, 0], sizes = [14, 84], strides = [1, 1]} : vector<14x168xf32> to vector<14x84xf32>
    %65 = vector.extract_strided_slice %63 {offsets = [0, 84], sizes = [14, 84], strides = [1, 1]} : vector<14x168xf32> to vector<14x84xf32>
    %66 = arith.maximumf %64, %65 : vector<14x84xf32>
    %67 = arith.maximumf %33, %66 : vector<14x84xf32>
    %cst_56 = arith.constant 0.000000e+00 : f32
    %68 = vector.broadcast %cst_56 : f32 to vector<14x168xf32>
    %c32_57 = arith.constant 32 : index
    %c0_58 = arith.constant 0 : index
    %69 = vector.load %arg1[%c32_57, %c0_58] : memref<64x32xf32, #tpu.memory_space<vmem>>, vector<14x32xf32>
    %c0_59 = arith.constant 0 : index
    %c0_60 = arith.constant 0 : index
    %c0_61 = arith.constant 0 : index
    %70 = vector.load %arg2[%c0_59, %c0_60, %c0_61] : memref<5x32x168xf32, #tpu.memory_space<vmem>>, vector<1x32x168xf32>
    %71 = vector.shape_cast %70 : vector<1x32x168xf32> to vector<32x168xf32>
    %cst_62 = arith.constant dense<0.000000e+00> : vector<14x168xf32>
    %72 = tpu.matmul %69, %71, %cst_62 {dimension_numbers = #tpu.dot_dimension_numbers<[1], [0], [0], [1], [0, 0, 1, 1], [], []>} : vector<14x32xf32>, vector<32x168xf32>, vector<14x168xf32> -> vector<14x168xf32>
    %73 = arith.addf %68, %72 : vector<14x168xf32>
    %c48_63 = arith.constant 48 : index
    %c0_64 = arith.constant 0 : index
    %74 = vector.load %arg1[%c48_63, %c0_64] : memref<64x32xf32, #tpu.memory_space<vmem>>, vector<14x32xf32>
    %c1_65 = arith.constant 1 : index
    %c0_66 = arith.constant 0 : index
    %c0_67 = arith.constant 0 : index
    %75 = vector.load %arg2[%c1_65, %c0_66, %c0_67] : memref<5x32x168xf32, #tpu.memory_space<vmem>>, vector<1x32x168xf32>
    %76 = vector.shape_cast %75 : vector<1x32x168xf32> to vector<32x168xf32>
    %cst_68 = arith.constant dense<0.000000e+00> : vector<14x168xf32>
    %77 = tpu.matmul %74, %76, %cst_68 {dimension_numbers = #tpu.dot_dimension_numbers<[1], [0], [0], [1], [0, 0, 1, 1], [], []>} : vector<14x32xf32>, vector<32x168xf32>, vector<14x168xf32> -> vector<14x168xf32>
    %78 = arith.addf %73, %77 : vector<14x168xf32>
    %c2_69 = arith.constant 2 : index
    %c0_70 = arith.constant 0 : index
    %79 = vector.load %arg1[%c2_69, %c0_70] : memref<64x32xf32, #tpu.memory_space<vmem>>, vector<14x32xf32>
    %c2_71 = arith.constant 2 : index
    %c0_72 = arith.constant 0 : index
    %c0_73 = arith.constant 0 : index
    %80 = vector.load %arg2[%c2_71, %c0_72, %c0_73] : memref<5x32x168xf32, #tpu.memory_space<vmem>>, vector<1x32x168xf32>
    %81 = vector.shape_cast %80 : vector<1x32x168xf32> to vector<32x168xf32>
    %cst_74 = arith.constant dense<0.000000e+00> : vector<14x168xf32>
    %82 = tpu.matmul %79, %81, %cst_74 {dimension_numbers = #tpu.dot_dimension_numbers<[1], [0], [0], [1], [0, 0, 1, 1], [], []>} : vector<14x32xf32>, vector<32x168xf32>, vector<14x168xf32> -> vector<14x168xf32>
    %83 = arith.addf %78, %82 : vector<14x168xf32>
    %c18_75 = arith.constant 18 : index
    %c0_76 = arith.constant 0 : index
    %84 = vector.load %arg1[%c18_75, %c0_76] : memref<64x32xf32, #tpu.memory_space<vmem>>, vector<14x32xf32>
    %c3_77 = arith.constant 3 : index
    %c0_78 = arith.constant 0 : index
    %c0_79 = arith.constant 0 : index
    %85 = vector.load %arg2[%c3_77, %c0_78, %c0_79] : memref<5x32x168xf32, #tpu.memory_space<vmem>>, vector<1x32x168xf32>
    %86 = vector.shape_cast %85 : vector<1x32x168xf32> to vector<32x168xf32>
    %cst_80 = arith.constant dense<0.000000e+00> : vector<14x168xf32>
    %87 = tpu.matmul %84, %86, %cst_80 {dimension_numbers = #tpu.dot_dimension_numbers<[1], [0], [0], [1], [0, 0, 1, 1], [], []>} : vector<14x32xf32>, vector<32x168xf32>, vector<14x168xf32> -> vector<14x168xf32>
    %88 = arith.addf %83, %87 : vector<14x168xf32>
    %c34 = arith.constant 34 : index
    %c0_81 = arith.constant 0 : index
    %89 = vector.load %arg1[%c34, %c0_81] : memref<64x32xf32, #tpu.memory_space<vmem>>, vector<14x32xf32>
    %c4_82 = arith.constant 4 : index
    %c0_83 = arith.constant 0 : index
    %c0_84 = arith.constant 0 : index
    %90 = vector.load %arg2[%c4_82, %c0_83, %c0_84] : memref<5x32x168xf32, #tpu.memory_space<vmem>>, vector<1x32x168xf32>
    %91 = vector.shape_cast %90 : vector<1x32x168xf32> to vector<32x168xf32>
    %cst_85 = arith.constant dense<0.000000e+00> : vector<14x168xf32>
    %92 = tpu.matmul %89, %91, %cst_85 {dimension_numbers = #tpu.dot_dimension_numbers<[1], [0], [0], [1], [0, 0, 1, 1], [], []>} : vector<14x32xf32>, vector<32x168xf32>, vector<14x168xf32> -> vector<14x168xf32>
    %93 = arith.addf %88, %92 : vector<14x168xf32>
    %94 = vector.broadcast %0 : vector<1x168xf32> to vector<14x168xf32>
    %95 = arith.addf %93, %94 : vector<14x168xf32>
    %cst_86 = arith.constant 0.000000e+00 : f32
    %96 = vector.broadcast %cst_86 : f32 to vector<14x168xf32>
    %97 = arith.maximumf %95, %96 : vector<14x168xf32>
    %98 = vector.extract_strided_slice %97 {offsets = [0, 0], sizes = [14, 84], strides = [1, 1]} : vector<14x168xf32> to vector<14x84xf32>
    %99 = vector.extract_strided_slice %97 {offsets = [0, 84], sizes = [14, 84], strides = [1, 1]} : vector<14x168xf32> to vector<14x84xf32>
    %100 = arith.maximumf %98, %99 : vector<14x84xf32>
    %cst_87 = arith.constant 0.000000e+00 : f32
    %101 = vector.broadcast %cst_87 : f32 to vector<14x168xf32>
    %c48_88 = arith.constant 48 : index
    %c0_89 = arith.constant 0 : index
    %102 = vector.load %arg1[%c48_88, %c0_89] : memref<64x32xf32, #tpu.memory_space<vmem>>, vector<14x32xf32>
    %c0_90 = arith.constant 0 : index
    %c0_91 = arith.constant 0 : index
    %c0_92 = arith.constant 0 : index
    %103 = vector.load %arg2[%c0_90, %c0_91, %c0_92] : memref<5x32x168xf32, #tpu.memory_space<vmem>>, vector<1x32x168xf32>
    %104 = vector.shape_cast %103 : vector<1x32x168xf32> to vector<32x168xf32>
    %cst_93 = arith.constant dense<0.000000e+00> : vector<14x168xf32>
    %105 = tpu.matmul %102, %104, %cst_93 {dimension_numbers = #tpu.dot_dimension_numbers<[1], [0], [0], [1], [0, 0, 1, 1], [], []>} : vector<14x32xf32>, vector<32x168xf32>, vector<14x168xf32> -> vector<14x168xf32>
    %106 = arith.addf %101, %105 : vector<14x168xf32>
    %c2_94 = arith.constant 2 : index
    %c0_95 = arith.constant 0 : index
    %107 = vector.load %arg1[%c2_94, %c0_95] : memref<64x32xf32, #tpu.memory_space<vmem>>, vector<14x32xf32>
    %c1_96 = arith.constant 1 : index
    %c0_97 = arith.constant 0 : index
    %c0_98 = arith.constant 0 : index
    %108 = vector.load %arg2[%c1_96, %c0_97, %c0_98] : memref<5x32x168xf32, #tpu.memory_space<vmem>>, vector<1x32x168xf32>
    %109 = vector.shape_cast %108 : vector<1x32x168xf32> to vector<32x168xf32>
    %cst_99 = arith.constant dense<0.000000e+00> : vector<14x168xf32>
    %110 = tpu.matmul %107, %109, %cst_99 {dimension_numbers = #tpu.dot_dimension_numbers<[1], [0], [0], [1], [0, 0, 1, 1], [], []>} : vector<14x32xf32>, vector<32x168xf32>, vector<14x168xf32> -> vector<14x168xf32>
    %111 = arith.addf %106, %110 : vector<14x168xf32>
    %c18_100 = arith.constant 18 : index
    %c0_101 = arith.constant 0 : index
    %112 = vector.load %arg1[%c18_100, %c0_101] : memref<64x32xf32, #tpu.memory_space<vmem>>, vector<14x32xf32>
    %c2_102 = arith.constant 2 : index
    %c0_103 = arith.constant 0 : index
    %c0_104 = arith.constant 0 : index
    %113 = vector.load %arg2[%c2_102, %c0_103, %c0_104] : memref<5x32x168xf32, #tpu.memory_space<vmem>>, vector<1x32x168xf32>
    %114 = vector.shape_cast %113 : vector<1x32x168xf32> to vector<32x168xf32>
    %cst_105 = arith.constant dense<0.000000e+00> : vector<14x168xf32>
    %115 = tpu.matmul %112, %114, %cst_105 {dimension_numbers = #tpu.dot_dimension_numbers<[1], [0], [0], [1], [0, 0, 1, 1], [], []>} : vector<14x32xf32>, vector<32x168xf32>, vector<14x168xf32> -> vector<14x168xf32>
    %116 = arith.addf %111, %115 : vector<14x168xf32>
    %c34_106 = arith.constant 34 : index
    %c0_107 = arith.constant 0 : index
    %117 = vector.load %arg1[%c34_106, %c0_107] : memref<64x32xf32, #tpu.memory_space<vmem>>, vector<14x32xf32>
    %c3_108 = arith.constant 3 : index
    %c0_109 = arith.constant 0 : index
    %c0_110 = arith.constant 0 : index
    %118 = vector.load %arg2[%c3_108, %c0_109, %c0_110] : memref<5x32x168xf32, #tpu.memory_space<vmem>>, vector<1x32x168xf32>
    %119 = vector.shape_cast %118 : vector<1x32x168xf32> to vector<32x168xf32>
    %cst_111 = arith.constant dense<0.000000e+00> : vector<14x168xf32>
    %120 = tpu.matmul %117, %119, %cst_111 {dimension_numbers = #tpu.dot_dimension_numbers<[1], [0], [0], [1], [0, 0, 1, 1], [], []>} : vector<14x32xf32>, vector<32x168xf32>, vector<14x168xf32> -> vector<14x168xf32>
    %121 = arith.addf %116, %120 : vector<14x168xf32>
    %c50 = arith.constant 50 : index
    %c0_112 = arith.constant 0 : index
    %122 = vector.load %arg1[%c50, %c0_112] : memref<64x32xf32, #tpu.memory_space<vmem>>, vector<14x32xf32>
    %c4_113 = arith.constant 4 : index
    %c0_114 = arith.constant 0 : index
    %c0_115 = arith.constant 0 : index
    %123 = vector.load %arg2[%c4_113, %c0_114, %c0_115] : memref<5x32x168xf32, #tpu.memory_space<vmem>>, vector<1x32x168xf32>
    %124 = vector.shape_cast %123 : vector<1x32x168xf32> to vector<32x168xf32>
    %cst_116 = arith.constant dense<0.000000e+00> : vector<14x168xf32>
    %125 = tpu.matmul %122, %124, %cst_116 {dimension_numbers = #tpu.dot_dimension_numbers<[1], [0], [0], [1], [0, 0, 1, 1], [], []>} : vector<14x32xf32>, vector<32x168xf32>, vector<14x168xf32> -> vector<14x168xf32>
    %126 = arith.addf %121, %125 : vector<14x168xf32>
    %127 = vector.broadcast %0 : vector<1x168xf32> to vector<14x168xf32>
    %128 = arith.addf %126, %127 : vector<14x168xf32>
    %cst_117 = arith.constant 0.000000e+00 : f32
    %129 = vector.broadcast %cst_117 : f32 to vector<14x168xf32>
    %130 = arith.maximumf %128, %129 : vector<14x168xf32>
    %131 = vector.extract_strided_slice %130 {offsets = [0, 0], sizes = [14, 84], strides = [1, 1]} : vector<14x168xf32> to vector<14x84xf32>
    %132 = vector.extract_strided_slice %130 {offsets = [0, 84], sizes = [14, 84], strides = [1, 1]} : vector<14x168xf32> to vector<14x84xf32>
    %133 = arith.maximumf %131, %132 : vector<14x84xf32>
    %134 = arith.maximumf %100, %133 : vector<14x84xf32>
    %c0_118 = arith.constant 0 : index
    %c0_119 = arith.constant 0 : index
    %135 = vector.load %arg5[%c0_118, %c0_119] : memref<1x160xf32, #tpu.memory_space<vmem>>, vector<1x160xf32>
    %cst_120 = arith.constant 0.000000e+00 : f32
    %136 = vector.broadcast %cst_120 : f32 to vector<10x160xf32>
    %137 = vector.extract_strided_slice %67 {offsets = [0, 0], sizes = [10, 84], strides = [1, 1]} : vector<14x84xf32> to vector<10x84xf32>
    %c0_121 = arith.constant 0 : index
    %c0_122 = arith.constant 0 : index
    %c0_123 = arith.constant 0 : index
    %138 = vector.load %arg4[%c0_121, %c0_122, %c0_123] : memref<5x84x160xf32, #tpu.memory_space<vmem>>, vector<1x84x160xf32>
    %139 = vector.shape_cast %138 : vector<1x84x160xf32> to vector<84x160xf32>
    %cst_124 = arith.constant dense<0.000000e+00> : vector<10x160xf32>
    %140 = tpu.matmul %137, %139, %cst_124 {dimension_numbers = #tpu.dot_dimension_numbers<[1], [0], [0], [1], [0, 0, 1, 1], [], []>} : vector<10x84xf32>, vector<84x160xf32>, vector<10x160xf32> -> vector<10x160xf32>
    %141 = arith.addf %136, %140 : vector<10x160xf32>
    %142 = vector.extract_strided_slice %134 {offsets = [0, 0], sizes = [10, 84], strides = [1, 1]} : vector<14x84xf32> to vector<10x84xf32>
    %c1_125 = arith.constant 1 : index
    %c0_126 = arith.constant 0 : index
    %c0_127 = arith.constant 0 : index
    %143 = vector.load %arg4[%c1_125, %c0_126, %c0_127] : memref<5x84x160xf32, #tpu.memory_space<vmem>>, vector<1x84x160xf32>
    %144 = vector.shape_cast %143 : vector<1x84x160xf32> to vector<84x160xf32>
    %cst_128 = arith.constant dense<0.000000e+00> : vector<10x160xf32>
    %145 = tpu.matmul %142, %144, %cst_128 {dimension_numbers = #tpu.dot_dimension_numbers<[1], [0], [0], [1], [0, 0, 1, 1], [], []>} : vector<10x84xf32>, vector<84x160xf32>, vector<10x160xf32> -> vector<10x160xf32>
    %146 = arith.addf %141, %145 : vector<10x160xf32>
    %147 = vector.extract_strided_slice %67 {offsets = [2, 0], sizes = [10, 84], strides = [1, 1]} : vector<14x84xf32> to vector<10x84xf32>
    %c2_129 = arith.constant 2 : index
    %c0_130 = arith.constant 0 : index
    %c0_131 = arith.constant 0 : index
    %148 = vector.load %arg4[%c2_129, %c0_130, %c0_131] : memref<5x84x160xf32, #tpu.memory_space<vmem>>, vector<1x84x160xf32>
    %149 = vector.shape_cast %148 : vector<1x84x160xf32> to vector<84x160xf32>
    %cst_132 = arith.constant dense<0.000000e+00> : vector<10x160xf32>
    %150 = tpu.matmul %147, %149, %cst_132 {dimension_numbers = #tpu.dot_dimension_numbers<[1], [0], [0], [1], [0, 0, 1, 1], [], []>} : vector<10x84xf32>, vector<84x160xf32>, vector<10x160xf32> -> vector<10x160xf32>
    %151 = arith.addf %146, %150 : vector<10x160xf32>
    %152 = vector.extract_strided_slice %134 {offsets = [2, 0], sizes = [10, 84], strides = [1, 1]} : vector<14x84xf32> to vector<10x84xf32>
    %c3_133 = arith.constant 3 : index
    %c0_134 = arith.constant 0 : index
    %c0_135 = arith.constant 0 : index
    %153 = vector.load %arg4[%c3_133, %c0_134, %c0_135] : memref<5x84x160xf32, #tpu.memory_space<vmem>>, vector<1x84x160xf32>
    %154 = vector.shape_cast %153 : vector<1x84x160xf32> to vector<84x160xf32>
    %cst_136 = arith.constant dense<0.000000e+00> : vector<10x160xf32>
    %155 = tpu.matmul %152, %154, %cst_136 {dimension_numbers = #tpu.dot_dimension_numbers<[1], [0], [0], [1], [0, 0, 1, 1], [], []>} : vector<10x84xf32>, vector<84x160xf32>, vector<10x160xf32> -> vector<10x160xf32>
    %156 = arith.addf %151, %155 : vector<10x160xf32>
    %157 = vector.extract_strided_slice %67 {offsets = [4, 0], sizes = [10, 84], strides = [1, 1]} : vector<14x84xf32> to vector<10x84xf32>
    %c4_137 = arith.constant 4 : index
    %c0_138 = arith.constant 0 : index
    %c0_139 = arith.constant 0 : index
    %158 = vector.load %arg4[%c4_137, %c0_138, %c0_139] : memref<5x84x160xf32, #tpu.memory_space<vmem>>, vector<1x84x160xf32>
    %159 = vector.shape_cast %158 : vector<1x84x160xf32> to vector<84x160xf32>
    %cst_140 = arith.constant dense<0.000000e+00> : vector<10x160xf32>
    %160 = tpu.matmul %157, %159, %cst_140 {dimension_numbers = #tpu.dot_dimension_numbers<[1], [0], [0], [1], [0, 0, 1, 1], [], []>} : vector<10x84xf32>, vector<84x160xf32>, vector<10x160xf32> -> vector<10x160xf32>
    %161 = arith.addf %156, %160 : vector<10x160xf32>
    %162 = vector.broadcast %135 : vector<1x160xf32> to vector<10x160xf32>
    %163 = arith.addf %161, %162 : vector<10x160xf32>
    %cst_141 = arith.constant 0.000000e+00 : f32
    %164 = vector.broadcast %cst_141 : f32 to vector<10x160xf32>
    %165 = arith.maximumf %163, %164 : vector<10x160xf32>
    %166 = vector.extract_strided_slice %165 {offsets = [0, 0], sizes = [10, 80], strides = [1, 1]} : vector<10x160xf32> to vector<10x80xf32>
    %167 = vector.extract_strided_slice %165 {offsets = [0, 80], sizes = [10, 80], strides = [1, 1]} : vector<10x160xf32> to vector<10x80xf32>
    %168 = arith.maximumf %166, %167 : vector<10x80xf32>
    %cst_142 = arith.constant 0.000000e+00 : f32
    %169 = vector.broadcast %cst_142 : f32 to vector<10x160xf32>
    %170 = vector.extract_strided_slice %134 {offsets = [0, 0], sizes = [10, 84], strides = [1, 1]} : vector<14x84xf32> to vector<10x84xf32>
    %c0_143 = arith.constant 0 : index
    %c0_144 = arith.constant 0 : index
    %c0_145 = arith.constant 0 : index
    %171 = vector.load %arg4[%c0_143, %c0_144, %c0_145] : memref<5x84x160xf32, #tpu.memory_space<vmem>>, vector<1x84x160xf32>
    %172 = vector.shape_cast %171 : vector<1x84x160xf32> to vector<84x160xf32>
    %cst_146 = arith.constant dense<0.000000e+00> : vector<10x160xf32>
    %173 = tpu.matmul %170, %172, %cst_146 {dimension_numbers = #tpu.dot_dimension_numbers<[1], [0], [0], [1], [0, 0, 1, 1], [], []>} : vector<10x84xf32>, vector<84x160xf32>, vector<10x160xf32> -> vector<10x160xf32>
    %174 = arith.addf %169, %173 : vector<10x160xf32>
    %175 = vector.extract_strided_slice %67 {offsets = [2, 0], sizes = [10, 84], strides = [1, 1]} : vector<14x84xf32> to vector<10x84xf32>
    %c1_147 = arith.constant 1 : index
    %c0_148 = arith.constant 0 : index
    %c0_149 = arith.constant 0 : index
    %176 = vector.load %arg4[%c1_147, %c0_148, %c0_149] : memref<5x84x160xf32, #tpu.memory_space<vmem>>, vector<1x84x160xf32>
    %177 = vector.shape_cast %176 : vector<1x84x160xf32> to vector<84x160xf32>
    %cst_150 = arith.constant dense<0.000000e+00> : vector<10x160xf32>
    %178 = tpu.matmul %175, %177, %cst_150 {dimension_numbers = #tpu.dot_dimension_numbers<[1], [0], [0], [1], [0, 0, 1, 1], [], []>} : vector<10x84xf32>, vector<84x160xf32>, vector<10x160xf32> -> vector<10x160xf32>
    %179 = arith.addf %174, %178 : vector<10x160xf32>
    %180 = vector.extract_strided_slice %134 {offsets = [2, 0], sizes = [10, 84], strides = [1, 1]} : vector<14x84xf32> to vector<10x84xf32>
    %c2_151 = arith.constant 2 : index
    %c0_152 = arith.constant 0 : index
    %c0_153 = arith.constant 0 : index
    %181 = vector.load %arg4[%c2_151, %c0_152, %c0_153] : memref<5x84x160xf32, #tpu.memory_space<vmem>>, vector<1x84x160xf32>
    %182 = vector.shape_cast %181 : vector<1x84x160xf32> to vector<84x160xf32>
    %cst_154 = arith.constant dense<0.000000e+00> : vector<10x160xf32>
    %183 = tpu.matmul %180, %182, %cst_154 {dimension_numbers = #tpu.dot_dimension_numbers<[1], [0], [0], [1], [0, 0, 1, 1], [], []>} : vector<10x84xf32>, vector<84x160xf32>, vector<10x160xf32> -> vector<10x160xf32>
    %184 = arith.addf %179, %183 : vector<10x160xf32>
    %185 = vector.extract_strided_slice %67 {offsets = [4, 0], sizes = [10, 84], strides = [1, 1]} : vector<14x84xf32> to vector<10x84xf32>
    %c3_155 = arith.constant 3 : index
    %c0_156 = arith.constant 0 : index
    %c0_157 = arith.constant 0 : index
    %186 = vector.load %arg4[%c3_155, %c0_156, %c0_157] : memref<5x84x160xf32, #tpu.memory_space<vmem>>, vector<1x84x160xf32>
    %187 = vector.shape_cast %186 : vector<1x84x160xf32> to vector<84x160xf32>
    %cst_158 = arith.constant dense<0.000000e+00> : vector<10x160xf32>
    %188 = tpu.matmul %185, %187, %cst_158 {dimension_numbers = #tpu.dot_dimension_numbers<[1], [0], [0], [1], [0, 0, 1, 1], [], []>} : vector<10x84xf32>, vector<84x160xf32>, vector<10x160xf32> -> vector<10x160xf32>
    %189 = arith.addf %184, %188 : vector<10x160xf32>
    %190 = vector.extract_strided_slice %134 {offsets = [4, 0], sizes = [10, 84], strides = [1, 1]} : vector<14x84xf32> to vector<10x84xf32>
    %c4_159 = arith.constant 4 : index
    %c0_160 = arith.constant 0 : index
    %c0_161 = arith.constant 0 : index
    %191 = vector.load %arg4[%c4_159, %c0_160, %c0_161] : memref<5x84x160xf32, #tpu.memory_space<vmem>>, vector<1x84x160xf32>
    %192 = vector.shape_cast %191 : vector<1x84x160xf32> to vector<84x160xf32>
    %cst_162 = arith.constant dense<0.000000e+00> : vector<10x160xf32>
    %193 = tpu.matmul %190, %192, %cst_162 {dimension_numbers = #tpu.dot_dimension_numbers<[1], [0], [0], [1], [0, 0, 1, 1], [], []>} : vector<10x84xf32>, vector<84x160xf32>, vector<10x160xf32> -> vector<10x160xf32>
    %194 = arith.addf %189, %193 : vector<10x160xf32>
    %195 = vector.broadcast %135 : vector<1x160xf32> to vector<10x160xf32>
    %196 = arith.addf %194, %195 : vector<10x160xf32>
    %cst_163 = arith.constant 0.000000e+00 : f32
    %197 = vector.broadcast %cst_163 : f32 to vector<10x160xf32>
    %198 = arith.maximumf %196, %197 : vector<10x160xf32>
    %199 = vector.extract_strided_slice %198 {offsets = [0, 0], sizes = [10, 80], strides = [1, 1]} : vector<10x160xf32> to vector<10x80xf32>
    %200 = vector.extract_strided_slice %198 {offsets = [0, 80], sizes = [10, 80], strides = [1, 1]} : vector<10x160xf32> to vector<10x80xf32>
    %201 = arith.maximumf %199, %200 : vector<10x80xf32>
    %202 = arith.maximumf %168, %201 : vector<10x80xf32>
    %cst_164 = arith.constant 0.000000e+00 : f32
    %203 = vector.broadcast %cst_164 : f32 to vector<2x10xf32>
    %204 = vector.extract_strided_slice %202 {offsets = [0, 0], sizes = [2, 80], strides = [1, 1]} : vector<10x80xf32> to vector<2x80xf32>
    %c0_165 = arith.constant 0 : index
    %c0_166 = arith.constant 0 : index
    %c0_167 = arith.constant 0 : index
    %205 = vector.load %arg6[%c0_165, %c0_166, %c0_167] : memref<5x80x10xf32, #tpu.memory_space<vmem>>, vector<1x80x10xf32>
    %206 = vector.shape_cast %205 : vector<1x80x10xf32> to vector<80x10xf32>
    %cst_168 = arith.constant dense<0.000000e+00> : vector<2x10xf32>
    %207 = tpu.matmul %204, %206, %cst_168 {dimension_numbers = #tpu.dot_dimension_numbers<[1], [0], [0], [1], [0, 0, 1, 1], [], []>} : vector<2x80xf32>, vector<80x10xf32>, vector<2x10xf32> -> vector<2x10xf32>
    %208 = arith.addf %203, %207 : vector<2x10xf32>
    %209 = vector.extract_strided_slice %202 {offsets = [2, 0], sizes = [2, 80], strides = [1, 1]} : vector<10x80xf32> to vector<2x80xf32>
    %c1_169 = arith.constant 1 : index
    %c0_170 = arith.constant 0 : index
    %c0_171 = arith.constant 0 : index
    %210 = vector.load %arg6[%c1_169, %c0_170, %c0_171] : memref<5x80x10xf32, #tpu.memory_space<vmem>>, vector<1x80x10xf32>
    %211 = vector.shape_cast %210 : vector<1x80x10xf32> to vector<80x10xf32>
    %cst_172 = arith.constant dense<0.000000e+00> : vector<2x10xf32>
    %212 = tpu.matmul %209, %211, %cst_172 {dimension_numbers = #tpu.dot_dimension_numbers<[1], [0], [0], [1], [0, 0, 1, 1], [], []>} : vector<2x80xf32>, vector<80x10xf32>, vector<2x10xf32> -> vector<2x10xf32>
    %213 = arith.addf %208, %212 : vector<2x10xf32>
    %214 = vector.extract_strided_slice %202 {offsets = [4, 0], sizes = [2, 80], strides = [1, 1]} : vector<10x80xf32> to vector<2x80xf32>
    %c2_173 = arith.constant 2 : index
    %c0_174 = arith.constant 0 : index
    %c0_175 = arith.constant 0 : index
    %215 = vector.load %arg6[%c2_173, %c0_174, %c0_175] : memref<5x80x10xf32, #tpu.memory_space<vmem>>, vector<1x80x10xf32>
    %216 = vector.shape_cast %215 : vector<1x80x10xf32> to vector<80x10xf32>
    %cst_176 = arith.constant dense<0.000000e+00> : vector<2x10xf32>
    %217 = tpu.matmul %214, %216, %cst_176 {dimension_numbers = #tpu.dot_dimension_numbers<[1], [0], [0], [1], [0, 0, 1, 1], [], []>} : vector<2x80xf32>, vector<80x10xf32>, vector<2x10xf32> -> vector<2x10xf32>
    %218 = arith.addf %213, %217 : vector<2x10xf32>
    %219 = vector.extract_strided_slice %202 {offsets = [6, 0], sizes = [2, 80], strides = [1, 1]} : vector<10x80xf32> to vector<2x80xf32>
    %c3_177 = arith.constant 3 : index
    %c0_178 = arith.constant 0 : index
    %c0_179 = arith.constant 0 : index
    %220 = vector.load %arg6[%c3_177, %c0_178, %c0_179] : memref<5x80x10xf32, #tpu.memory_space<vmem>>, vector<1x80x10xf32>
    %221 = vector.shape_cast %220 : vector<1x80x10xf32> to vector<80x10xf32>
    %cst_180 = arith.constant dense<0.000000e+00> : vector<2x10xf32>
    %222 = tpu.matmul %219, %221, %cst_180 {dimension_numbers = #tpu.dot_dimension_numbers<[1], [0], [0], [1], [0, 0, 1, 1], [], []>} : vector<2x80xf32>, vector<80x10xf32>, vector<2x10xf32> -> vector<2x10xf32>
    %223 = arith.addf %218, %222 : vector<2x10xf32>
    %224 = vector.extract_strided_slice %202 {offsets = [8, 0], sizes = [2, 80], strides = [1, 1]} : vector<10x80xf32> to vector<2x80xf32>
    %c4_181 = arith.constant 4 : index
    %c0_182 = arith.constant 0 : index
    %c0_183 = arith.constant 0 : index
    %225 = vector.load %arg6[%c4_181, %c0_182, %c0_183] : memref<5x80x10xf32, #tpu.memory_space<vmem>>, vector<1x80x10xf32>
    %226 = vector.shape_cast %225 : vector<1x80x10xf32> to vector<80x10xf32>
    %cst_184 = arith.constant dense<0.000000e+00> : vector<2x10xf32>
    %227 = tpu.matmul %224, %226, %cst_184 {dimension_numbers = #tpu.dot_dimension_numbers<[1], [0], [0], [1], [0, 0, 1, 1], [], []>} : vector<2x80xf32>, vector<80x10xf32>, vector<2x10xf32> -> vector<2x10xf32>
    %228 = arith.addf %223, %227 : vector<2x10xf32>
    %c0_185 = arith.constant 0 : index
    %c0_186 = arith.constant 0 : index
    %229 = vector.load %arg7[%c0_185, %c0_186] : memref<1x10xf32, #tpu.memory_space<vmem>>, vector<1x10xf32>
    %230 = vector.broadcast %229 : vector<1x10xf32> to vector<2x10xf32>
    %231 = arith.addf %228, %230 : vector<2x10xf32>
    %c0_187 = arith.constant 0 : index
    %c0_188 = arith.constant 0 : index
    %232 = vector.load %arg8[%c0_187, %c0_188] : memref<2x10xf32, #tpu.memory_space<vmem>>, vector<2x10xf32>
    tpu.vector_store %arg8[%c0_187, %c0_188], %231 {strides = array<i32>} : memref<2x10xf32, #tpu.memory_space<vmem>>, vector<2x10xf32>,
    return
  }
  func.func @transform_0(%arg0: i32) -> (i32, i32) {
    %c0_i32 = arith.constant 0 : i32
    %c0_i32_0 = arith.constant 0 : i32
    %c0_i32_1 = arith.constant 0 : i32
    return %c0_i32, %c0_i32_0 : i32, i32
  }
  func.func @transform_1(%arg0: i32) -> (i32, i32, i32) {
    %c0_i32 = arith.constant 0 : i32
    %c0_i32_0 = arith.constant 0 : i32
    %c0_i32_1 = arith.constant 0 : i32
    %c0_i32_2 = arith.constant 0 : i32
    return %c0_i32, %c0_i32_0, %c0_i32_1 : i32, i32, i32
  }
  func.func @transform_2(%arg0: i32) -> (i32, i32) {
    %c0_i32 = arith.constant 0 : i32
    %c0_i32_0 = arith.constant 0 : i32
    %c0_i32_1 = arith.constant 0 : i32
    return %c0_i32, %c0_i32_0 : i32, i32
  }
  func.func @transform_3(%arg0: i32) -> (i32, i32, i32) {
    %c0_i32 = arith.constant 0 : i32
    %c0_i32_0 = arith.constant 0 : i32
    %c0_i32_1 = arith.constant 0 : i32
    %c0_i32_2 = arith.constant 0 : i32
    return %c0_i32, %c0_i32_0, %c0_i32_1 : i32, i32, i32
  }
  func.func @transform_4(%arg0: i32) -> (i32, i32) {
    %c0_i32 = arith.constant 0 : i32
    %c0_i32_0 = arith.constant 0 : i32
    %c0_i32_1 = arith.constant 0 : i32
    return %c0_i32, %c0_i32_0 : i32, i32
  }
  func.func @transform_5(%arg0: i32) -> (i32, i32, i32) {
    %c0_i32 = arith.constant 0 : i32
    %c0_i32_0 = arith.constant 0 : i32
    %c0_i32_1 = arith.constant 0 : i32
    %c0_i32_2 = arith.constant 0 : i32
    return %c0_i32, %c0_i32_0, %c0_i32_1 : i32, i32, i32
  }
  func.func @transform_6(%arg0: i32) -> (i32, i32) {
    %c0_i32 = arith.constant 0 : i32
    %c0_i32_0 = arith.constant 0 : i32
    %c0_i32_1 = arith.constant 0 : i32
    return %c0_i32, %c0_i32_0 : i32, i32
  }
  func.func @transform_7(%arg0: i32) -> (i32, i32) {
    %c0_i32 = arith.constant 0 : i32
    %c0_i32_0 = arith.constant 0 : i32
    %c0_i32_1 = arith.constant 0 : i32
    return %c0_i32, %c0_i32_0 : i32, i32
  }
}

</mosaic_0001>

<bundles_post_ra>
// kernel: lenet5_forward.1
= control target key start
LH: loop header
LB: loop body
LE: loop exit
PB: predicated region body
PF: predicated region fallthrough
CT: control target
= control target key end

     0   :  { %v4317_v7 = vmov 0.0   ;;  %vm49_vm0 = vcmask 261120   ;;  %s5689_s0 = inlined_call_operand.vmem [shape: f32[64,32], index: 0, kind: input, shape index: {}]   ;;  %s5690_s1 = inlined_call_operand.vmem [shape: f32[5,32,168], index: 1, kind: input, shape index: {}]   ;;  %s5691_s2 = inlined_call_operand.vmem [shape: f32[1,168], index: 2, kind: input, shape index: {}]   ;;  %s5692_s3 = inlined_call_operand.vmem [shape: f32[5,84,160], index: 3, kind: input, shape index: {}]   ;;  %s5693_s4 = inlined_call_operand.vmem [shape: f32[1,160], index: 4, kind: input, shape index: {}]   ;;  %s5694_s5 = inlined_call_operand.vmem [shape: f32[5,80,10], index: 5, kind: input, shape index: {}]   ;;  %s5695_s6 = inlined_call_operand.vmem [shape: f32[1,10], index: 6, kind: input, shape index: {}]   ;;  %s5696_s7 = inlined_call_operand.hbm [shape: f32[2,10], index: 7, kind: output, shape index: {}]  }
   0x1   :  { %v3341_v0 = vld [vmem:[%s5690_s1 + $0x48] sm:$0xff]  ;;  %v3343_v1 = vld [vmem:[%s5690_s1 + $0x58] sm:$0xff]  ;;  %v3340_v5 = vld [vmem:[%s5690_s1 + $0x40] sm:$0xff]  ;;  %120 = vmatprep.mubr.f32.mxu1 %v4317_v7  ;;  %203 = vmatprep.mubr.f32.mxu0 %v4317_v7 }
   0x2   :  { %v31_v2 = vld [vmem:[%s5690_s1 + $0x8] sm:$0xff]  ;;  %v4372_v3 = vpack.c.bf16 %v3343_v1, %v3341_v0  ;;  %v33_v4 = vld [vmem:[%s5690_s1 + $0x18] sm:$0xff]  ;;  %v3342_v6 = vld [vmem:[%s5690_s1 + $0x50] sm:$0xff] }
   0x3   :  { %v4385_v8 = vpack.c.bf16 %v33_v4, %v31_v2  ;;  %v4387_v9 = vpack.c.bf16 %v3342_v6, %v3340_v5  ;;  %v30_v10 = vld [vmem:[%s5690_s1] sm:$0xff]  ;;  %v32_v11 = vld [vmem:[%s5690_s1 + $0x10] sm:$0xff]  ;;  %v3345_v12 = vld [vmem:[%s5690_s1 + $0x68] sm:$0xff] }
   0x4   :  { %3757 = vmatprep.subr.bf16.mxu1 %v4372_v3  ;;  %v4399_v13 = vpack.c.bf16 %v32_v11, %v30_v10  ;;  %v3347_v14 = vld [vmem:[%s5690_s1 + $0x78] sm:$0xff]  ;;  %v35_v15 = vld [vmem:[%s5690_s1 + $0x28] sm:$0xff]  ;;  %v3344_v19 = vld [vmem:[%s5690_s1 + $0x60] sm:$0xff] }
   0x5   :  { %v37_v16 = vld [vmem:[%s5690_s1 + $0x38] sm:$0xff]  ;;  %3765 = vmatprep.subr.bf16.mxu0 %v4385_v8  ;;  %3759 = vmatpush1.bf16.msra.mxu1 %v4387_v9  ;;  %v4412_v17 = vpack.c.bf16 %v3347_v14, %v3345_v12  ;;  %v3346_v20 = vld [vmem:[%s5690_s1 + $0x70] sm:$0xff]  ;;  %v34_v21 = vld [vmem:[%s5690_s1 + $0x20] sm:$0xff] }
   0x6   :  { %v4414_v18 = vpack.c.bf16 %v37_v16, %v35_v15  ;;  %3767 = vmatpush1.bf16.msra.mxu0 %v4399_v13  ;;  %v4426_v22 = vpack.c.bf16 %v3346_v20, %v3344_v19  ;;  %v36_v23 = vld [vmem:[%s5690_s1 + $0x30] sm:$0xff]  ;;  %v3353_v25 = vld [vmem:[%s5690_s1 + $0x88] sm:$0xff]  ;;  %v3355_v26 = vld [vmem:[%s5690_s1 + $0x98] sm:$0xff] }
   0x7   :  { %3761 = vmatprep.subr.bf16.mxu1 %v4412_v17  ;;  %v4433_v24 = vpack.c.bf16 %v36_v23, %v34_v21  ;;  %v3352_v27 = vld [vmem:[%s5690_s1 + $0x80] sm:$0xff]  ;;  %v4444_v28 = vpack.c.bf16 %v3355_v26, %v3353_v25  ;;  %v3354_v29 = vld [vmem:[%s5690_s1 + $0x90] sm:$0xff]  ;;  %v3357_v31 = vld [vmem:[%s5690_s1 + $0xa8] sm:$0xff] }
   0x8   :  { %3769 = vmatprep.subr.bf16.mxu0 %v4414_v18  ;;  %v4453_v30 = vld [vmem:[%s5689_s0 + $0x10] sm:$0xff]  ;;  %v3359_v32 = vld [vmem:[%s5690_s1 + $0xb8] sm:$0xff]  ;;  %v28_v33 = vld [vmem:[%s5689_s0] sm:$0xff]  ;;  %v4466_v34 = vpack.c.bf16 %v3354_v29, %v3352_v27 }
   0x9   :  { %3763 = vmatpush1.bf16.msra.mxu1 %v4426_v22  ;;  %v4469_v35 = vpack.c.bf16 %v3359_v32, %v3357_v31  ;;  %v3356_v36 = vld [vmem:[%s5690_s1 + $0xa0] sm:$0xff]  ;;  %v3358_v37 = vld [vmem:[%s5690_s1 + $0xb0] sm:$0xff]  ;;  %v3363_v38 = vld [vmem:[%s5690_s1 + $0xc8] sm:$0xff] }
   0xa   :  { %3771 = vmatpush1.bf16.msra.mxu0 %v4433_v24  ;;  %3797 = vmatprep.subr.bf16.mxu1 %v4372_v3  ;;  %v3365_v39 = vld [vmem:[%s5690_s1 + $0xd8] sm:$0xff]  ;;  %v29_v41 = vld [vmem:[%s5689_s0 + $0x8] sm:$0x3f]  ;;  %v4497_v42 = vpack.c.bf16 %v3358_v37, %v3356_v36  ;;  %v3362_v44 = vld [vmem:[%s5690_s1 + $0xc0] sm:$0xff] }
   0xb   :  { %3773 = vmatprep.subr.bf16.mxu0 %v4444_v28  ;;  %v4490_v40 = vld [vmem:[%s5689_s0 + $0x18] sm:$0x3f]  ;;  %v4501_v43 = vpack.c.bf16 %v3365_v39, %v3363_v38  ;;  %v3364_v45 = vld [vmem:[%s5690_s1 + $0xd0] sm:$0xff]  ;;  %v3367_v46 = vld [vmem:[%s5690_s1 + $0xe8] sm:$0xff] }
   0xc   :  { %3348 = vmatmul.mubr.msk.f32.vlgmr.msra.gmra.mrb[0].mxu1 %vm49_vm0, %v4453_v30  ;;  %v3369_v47 = vld [vmem:[%s5690_s1 + $0xf8] sm:$0xff]  ;;  %v4523_v48 = vld [vmem:[%s5689_s0 + $0x20] sm:$0xff]  ;;  %v4527_v49 = vpack.c.bf16 %v3364_v45, %v3362_v44  ;;  %v3368_v52 = vld [vmem:[%s5690_s1 + $0xf0] sm:$0xff] }
   0xd   :  { %3350 = vmatmul.mubr.msk.f32.vlgmr.msra.gmra.mrb[0].mxu0 %vm49_vm0, %v28_v33  ;;  %3799 = vmatpush1.bf16.msra.mxu1 %v4387_v9  ;;  %v4531_v50 = vpack.c.bf16 %v3369_v47, %v3367_v46  ;;  %v3366_v51 = vld [vmem:[%s5690_s1 + $0xe0] sm:$0xff] }
   0xe   :  { %3775 = vmatpush1.bf16.msra.mxu0 %v4466_v34  ;;  %126 = vmatprep.mubr.f32.mxu1 %v4317_v7 }
   0xf   :  { %209 = vmatprep.mubr.f32.mxu0 %v4317_v7  ;;  %3777 = vmatprep.subr.bf16.mxu0 %v4469_v35 }
  0x10   :  { %3349 = vmatmul.mubr.msk.f32.gmra.mrb[2].mxu1 %vm49_vm0, %v4490_v40  ;;  %3801 = vmatprep.subr.bf16.mxu1 %v4412_v17 }
  0x11   :  { %3351 = vmatmul.mubr.msk.f32.gmra.mrb[2].mxu0 %vm49_vm0, %v29_v41  ;;  %3803 = vmatpush1.bf16.msra.mxu1 %v4426_v22 }
  0x12   :  { %3779 = vmatpush1.bf16.msra.mxu0 %v4497_v42  ;;  %297 = vmatprep.mubr.f32.mxu0 %v4317_v7 }
  0x13   :  { %612 = vmatprep.mubr.f32.mxu1 %v4317_v7  ;;  %3781 = vmatprep.subr.bf16.mxu0 %v4501_v43 }
  0x14   :  { %12 = vsyncpa [#allocation3], 0  ;;  %3382 = vmatmul.mubr.msk.f32.vlgmr.msra.gmra.mrb[4].mxu1 %vm49_vm0, %v4523_v48  ;;  %3805 = vmatprep.subr.bf16.mxu1 %v4385_v8  ;;  %v3373_v53 = vld [vmem:[%s5690_s1 + $0x108] sm:$0xff]  ;;  %v3375_v54 = vld [vmem:[%s5690_s1 + $0x118] sm:$0xff]  ;;  %v4558_v56 = vpack.c.bf16 %v3368_v52, %v3366_v51  ;;  %s4318_s20 = smov 44   ;;  %vm1898_vm1 = vcmask 1043456  }
  0x15   :  { %3360 = vmatmul.mubr.msk.f32.vlgmr.msra.gmra.mrb[0].mxu0 %vm49_vm0, %v4523_v48  ;;  %3807 = vmatpush1.bf16.msra.mxu1 %v4399_v13  ;;  %v4554_v55 = vld [vmem:[%s5689_s0 + $0x28] sm:$0x3f]  ;;  %v4562_v57 = vpack.c.bf16 %v3375_v54, %v3373_v53  ;;  %v3372_v58 = vld [vmem:[%s5690_s1 + $0x100] sm:$0xff]  ;;  %v3374_v59 = vld [vmem:[%s5690_s1 + $0x110] sm:$0xff]  ;;  %vm541_vm2 = vcmask 359424   ;;  %vm1891_vm3 = vcmask 687104  }
  0x16   :  { %3783 = vmatpush1.bf16.msra.mxu0 %v4527_v49  ;;  %303 = vmatprep.mubr.f32.mxu0 %v4317_v7  ;;  %v3377_v60 = vld [vmem:[%s5690_s1 + $0x128] sm:$0xff]  ;;  %v3379_v61 = vld [vmem:[%s5690_s1 + $0x138] sm:$0xff]  ;;  %v4587_v62 = vld [vmem:[%s5689_s0 + $0x30] sm:$0xff]  ;;  %v4589_v63 = vpack.c.bf16 %v3374_v59, %v3372_v58  ;;  %vm2094_vm4 = vcmask 1045504   ;;  %vm4320_vm5 = vmmov 0   ;;  %s4321_s22 = smov 48  }
  0x17   :  { %618 = vmatprep.mubr.f32.mxu1 %v4317_v7  ;;  %3785 = vmatprep.subr.bf16.mxu0 %v4531_v50  ;;  %v4593_v0 = vpack.c.bf16 %v3379_v61, %v3377_v60  ;;  %v3376_v1 = vld [vmem:[%s5690_s1 + $0x120] sm:$0xff]  ;;  %v3378_v2 = vld [vmem:[%s5690_s1 + $0x130] sm:$0xff]  ;;  %v4612_v4 = vld [vmem:[%s5689_s0 + $0x38] sm:$0x3f]  ;;  %vm2454_vm6 = vcmask 392192   ;;  %vm2916_vm7 = vcmask 654336  }
  0x18   :  { %3383 = vmatmul.mubr.msk.f32.gmra.mrb[6].mxu1 %vm49_vm0, %v4554_v55  ;;  %3809 = vmatprep.subr.bf16.mxu1 %v4414_v18  ;;  %v4614_v5 = vpack.c.bf16 %v3378_v2, %v3376_v1  ;;  %v412_v6 = vld [vmem:[%s5689_s0 + $0x2] sm:$0xff]  ;;  %v413_v10 = vld [vmem:[%s5689_s0 + $0xa] sm:$0x3f]  ;;  %v864_v11 = vld [vmem:[%s5689_s0 + $0x12] sm:$0xff]  ;;  %s4322_s27 = smov [#allocation2]   ;;  %vm3324_vm8 = vcmask 74752  }
  0x19   :  { %3361 = vmatmul.mubr.msk.f32.gmra.mrb[2].mxu0 %vm49_vm0, %v4554_v55  ;;  %3811 = vmatpush1.bf16.msra.mxu1 %v4433_v24  ;;  %v865_v12 = vld [vmem:[%s5689_s0 + $0x1a] sm:$0x3f]  ;;  %v27_v21 = vld [vmem:[%s5691_s2] sm:$0x3]  ;;  %v3415_v23 = vld [vmem:[%s5692_s3 + $0xc8] sm:$0xff]  ;;  %s3332_s1 = sshll.u32 %s4322_s27, 4  ;;  %s3333_s1 = int_to_ptr.vmem [resolvable:$true] %s3332_s1 }
  0x1a   :  { %3787 = vmatpush1.bf16.msra.mxu0 %v4558_v56  ;;  %395 = vmatprep.mubr.f32.mxu0 %v4317_v7  ;;  %v3412_v26 = vld [vmem:[%s5692_s3 + $0xb0] sm:$0xff]  ;;  %v3414_v27 = vld [vmem:[%s5692_s3 + $0xc0] sm:$0xff]  ;;  %v3417_v31 = vld [vmem:[%s5692_s3 + $0xd8] sm:$0xff]  ;;  %s4293_s2 = scalar_lea.vmem %s3333_s1, 32  ;;  %p4298_p1 = scmp.lt.s32.totalorder %s3333_s1, %s3333_s1 }
  0x1b   :  { %689 = vmatprep.mubr.f32.mxu1 %v4317_v7  ;;  %3789 = vmatprep.subr.bf16.mxu0 %v4562_v57  ;;  %v3419_v32 = vld [vmem:[%s5692_s3 + $0xe8] sm:$0xff]  ;;  %v3416_v37 = vld [vmem:[%s5692_s3 + $0xd0] sm:$0xff]  ;;  %v3418_v38 = vld [vmem:[%s5692_s3 + $0xe0] sm:$0xff]  ;;  %p4294_p0 = scmp.ne.s32.totalorder %s3333_s1, %s4293_s2  ;;  %p4299_p2 = scmp.lt.s32.totalorder %s4293_s2, %s4293_s2 }
  0x1c   :  { %3384 = vmatmul.mubr.msk.f32.vlgmr.msra.gmra.mrb[4].mxu1 %vm49_vm0, %v4453_v30  ;;  %3813 = vmatprep.subr.bf16.mxu1 %v4444_v28  ;;  %v3920_v36 = vpack.c.bf16 %v3419_v32, %v3417_v31  ;;  %v3422_v51 = vld [vmem:[%s5692_s3 + $0x100] sm:$0xff]  ;;  %v3424_v61 = vld [vmem:[%s5692_s3 + $0x110] sm:$0xff]  ;;  %v3431_v1 = vld [vmem:[%s5692_s3 + $0x148] sm:$0xff] }
  0x1d   :  { %3370 = vmatmul.mubr.msk.f32.vlgmr.msra.gmra.mrb[0].mxu0 %vm49_vm0, %v4587_v62  ;;  %3815 = vmatpush1.bf16.msra.mxu1 %v4466_v34  ;;  %p4300_p3 = por %p4299_p2, %p4298_p1 }
  0x1e   :  { %3791 = vmatpush1.bf16.msra.mxu0 %v4589_v63  ;;  %401 = vmatprep.mubr.f32.mxu0 %v4317_v7 }
  0x1f   :  { %695 = vmatprep.mubr.f32.mxu1 %v4317_v7  ;;  %3793 = vmatprep.subr.bf16.mxu0 %v4593_v0  ;;  %p4301_p4 = pnand %p4300_p3, %p4294_p0 }
  0x20   :  { %3385 = vmatmul.mubr.msk.f32.gmra.mrb[6].mxu1 %vm49_vm0, %v4490_v40  ;;  %3817 = vmatprep.subr.bf16.mxu1 %v4469_v35  ;;  %v3922_v40 = vpack.c.bf16 %v3418_v38, %v3416_v37 }
  0x21   :  { %3371 = vmatmul.mubr.msk.f32.gmra.mrb[2].mxu0 %vm49_vm0, %v4612_v4  ;;  %3819 = vmatpush1.bf16.msra.mxu1 %v4497_v42 }
  0x22   :  { %3795 = vmatpush1.bf16.msra.mxu0 %v4614_v5  ;;  %493 = vmatprep.mubr.f32.mxu0 %v4317_v7 }
  0x23   :  { %766 = vmatprep.mubr.f32.mxu1 %v4317_v7  ;;  %3821 = vmatprep.subr.bf16.mxu1 %v4501_v43 }
  0x24   :  { %3386 = vmatmul.mubr.msk.f32.vlgmr.msra.gmra.mrb[4].mxu1 %vm49_vm0, %v4587_v62  ;;  %3837 = vmatprep.subr.bf16.mxu0 %v4372_v3 }
  0x25   :  { %3380 = vmatmul.mubr.msk.f32.vlgmr.msra.gmra.mrb[0].mxu0 %vm49_vm0, %v412_v6  ;;  %3823 = vmatpush1.bf16.msra.mxu1 %v4527_v49 }
  0x26   :  { %3839 = vmatpush1.bf16.msra.mxu0 %v4387_v9  ;;  %499 = vmatprep.mubr.f32.mxu0 %v4317_v7 }
  0x27   :  { %772 = vmatprep.mubr.f32.mxu1 %v4317_v7  ;;  %3825 = vmatprep.subr.bf16.mxu1 %v4531_v50 }
  0x28   :  { %3387 = vmatmul.mubr.msk.f32.gmra.mrb[6].mxu1 %vm49_vm0, %v4612_v4  ;;  %3841 = vmatprep.subr.bf16.mxu0 %v4412_v17 }
  0x29   :  { %3381 = vmatmul.mubr.msk.f32.gmra.mrb[2].mxu0 %vm49_vm0, %v413_v10  ;;  %3827 = vmatpush1.bf16.msra.mxu1 %v4558_v56 }
  0x2a   :  { %3843 = vmatpush1.bf16.msra.mxu0 %v4426_v22  ;;  %847 = vmatprep.mubr.f32.mxu1 %v4317_v7 }
  0x2b   :  { %1045 = vmatprep.mubr.f32.mxu0 %v4317_v7  ;;  %3829 = vmatprep.subr.bf16.mxu1 %v4562_v57 }
  0x2c   :  { %3388 = vmatmul.mubr.msk.f32.vlgmr.msra.gmra.mrb[4].mxu1 %vm49_vm0, %v412_v6  ;;  %3845 = vmatprep.subr.bf16.mxu0 %v4385_v8 }
  0x2d   :  { %3392 = vmatmul.mubr.msk.f32.vlgmr.msra.gmra.mrb[4].mxu0 %vm49_vm0, %v4587_v62  ;;  %3831 = vmatpush1.bf16.msra.mxu1 %v4589_v63 }
  0x2e   :  { %3847 = vmatpush1.bf16.msra.mxu0 %v4399_v13  ;;  %853 = vmatprep.mubr.f32.mxu1 %v4317_v7 }
  0x2f   :  { %1051 = vmatprep.mubr.f32.mxu0 %v4317_v7  ;;  %3833 = vmatprep.subr.bf16.mxu1 %v4593_v0 }
  0x30   :  { %3389 = vmatmul.mubr.msk.f32.gmra.mrb[6].mxu1 %vm49_vm0, %v413_v10  ;;  %3849 = vmatprep.subr.bf16.mxu0 %v4414_v18 }
  0x31   :  { %3393 = vmatmul.mubr.msk.f32.gmra.mrb[6].mxu0 %vm49_vm0, %v4612_v4  ;;  %3835 = vmatpush1.bf16.msra.mxu1 %v4614_v5 }
  0x32   :  { %3851 = vmatpush1.bf16.msra.mxu0 %v4433_v24  ;;  %936 = vmatprep.mubr.f32.mxu1 %v4317_v7 }
  0x33   :  { %1122 = vmatprep.mubr.f32.mxu0 %v4317_v7  ;;  %3853 = vmatprep.subr.bf16.mxu0 %v4444_v28 }
  0x34   :  { %3390 = vmatmul.mubr.msk.f32.vlgmr.msra.gmra.mrb[4].mxu1 %vm49_vm0, %v864_v11  ;;  %3877 = vmatprep.subr.bf16.mxu1 %v4372_v3  ;;  %v1297_v3 = vld [vmem:[%s5689_s0 + $0x22] sm:$0xff] }
  0x35   :  { %3394 = vmatmul.mubr.msk.f32.vlgmr.msra.gmra.mrb[4].mxu0 %vm49_vm0, %v4523_v48  ;;  %3879 = vmatpush1.bf16.msra.mxu1 %v4387_v9  ;;  %v1728_v9 = vld [vmem:[%s5689_s0 + $0x32] sm:$0xff] }
  0x36   :  { %3855 = vmatpush1.bf16.msra.mxu0 %v4466_v34  ;;  %942 = vmatprep.mubr.f32.mxu1 %v4317_v7 }
  0x37   :  { %1128 = vmatprep.mubr.f32.mxu0 %v4317_v7  ;;  %3857 = vmatprep.subr.bf16.mxu0 %v4469_v35 }
  0x38   :  { %3391 = vmatmul.mubr.msk.f32.gmra.mrb[6].mxu1 %vm49_vm0, %v865_v12  ;;  %3881 = vmatprep.subr.bf16.mxu1 %v4412_v17 }
  0x39   :  { %3395 = vmatmul.mubr.msk.f32.gmra.mrb[6].mxu0 %vm49_vm0, %v4554_v55  ;;  %3883 = vmatpush1.bf16.msra.mxu1 %v4426_v22  ;;  %v3413_v22 = vld [vmem:[%s5692_s3 + $0xb8] sm:$0xff] }
  0x3a   :  { %3859 = vmatpush1.bf16.msra.mxu0 %v4497_v42  ;;  %1199 = vmatprep.mubr.f32.mxu0 %v4317_v7  ;;  %v3916_v25 = vpack.c.bf16 %v3415_v23, %v3413_v22  ;;  %v3425_v55 = vld [vmem:[%s5692_s3 + $0x118] sm:$0xff] }
  0x3b   :  { %1476 = vmatprep.mubr.f32.mxu1 %v4317_v7  ;;  %3861 = vmatprep.subr.bf16.mxu0 %v4501_v43 }
  0x3c   :  { %3402 = vmatmul.mubr.msk.f32.vlgmr.msra.gmra.mrb[8].mxu1 %vm49_vm0, %v412_v6  ;;  %3885 = vmatprep.subr.bf16.mxu1 %v4385_v8  ;;  %v1298_v8 = vld [vmem:[%s5689_s0 + $0x2a] sm:$0x3f] }
  0x3d   :  { %3396 = vmatmul.mubr.msk.f32.vlgmr.msra.gmra.mrb[4].mxu0 %vm49_vm0, %v412_v6  ;;  %3887 = vmatpush1.bf16.msra.mxu1 %v4399_v13  ;;  %v1729_v13 = vld [vmem:[%s5689_s0 + $0x3a] sm:$0x3f]  ;;  %v3430_v6 = vld [vmem:[%s5692_s3 + $0x140] sm:$0xff] }
  0x3e   :  { %3863 = vmatpush1.bf16.msra.mxu0 %v4527_v49  ;;  %1205 = vmatprep.mubr.f32.mxu0 %v4317_v7 }
  0x3f   :  { %1482 = vmatprep.mubr.f32.mxu1 %v4317_v7  ;;  %3865 = vmatprep.subr.bf16.mxu0 %v4531_v50 }
  0x40   :  { %3403 = vmatmul.mubr.msk.f32.gmra.mrb[10].mxu1 %vm49_vm0, %v413_v10  ;;  %3889 = vmatprep.subr.bf16.mxu1 %v4414_v18  ;;  %v511_v18 = vlaneseq }
  0x41   :  { %3397 = vmatmul.mubr.msk.f32.gmra.mrb[6].mxu0 %vm49_vm0, %v413_v10  ;;  %3891 = vmatpush1.bf16.msra.mxu1 %v4433_v24 }
  0x42   :  { %3867 = vmatpush1.bf16.msra.mxu0 %v4558_v56  ;;  %1280 = vmatprep.mubr.f32.mxu0 %v4317_v7  ;;  %v4763_v19 = vshrl.u32 %v511_v18, 7 }
  0x43   :  { %1553 = vmatprep.mubr.f32.mxu1 %v4317_v7  ;;  %3869 = vmatprep.subr.bf16.mxu0 %v4562_v57 }
  0x44   :  { %3404 = vmatmul.mubr.msk.f32.vlgmr.msra.gmra.mrb[8].mxu1 %vm49_vm0, %v4587_v62  ;;  %3893 = vmatprep.subr.bf16.mxu1 %v4444_v28  ;;  %v513_v20 = vsub.s32 0, %v4763_v19  ;;  %v517_v24 = vsub.s32 1, %v4763_v19  ;;  %v3918_v28 = vpack.c.bf16 %v3414_v27, %v3412_v26  ;;  %v3426_v62 = vld [vmem:[%s5692_s3 + $0x120] sm:$0xff]  ;;  %v1849_v26 = vld [vmem:[%s5692_s3 + $0x18] sm:$0xff] }
  0x45   :  { %3398 = vmatmul.mubr.msk.f32.vlgmr.msra.gmra.mrb[4].mxu0 %vm49_vm0, %v864_v11  ;;  %3895 = vmatpush1.bf16.msra.mxu1 %v4466_v34 }
  0x46   :  { %3871 = vmatpush1.bf16.msra.mxu0 %v4589_v63  ;;  %1286 = vmatprep.mubr.f32.mxu0 %v4317_v7  ;;  %v4784_v29 = vrot.slane %v27_v21, %v513_v20 }
  0x47   :  { %1559 = vmatprep.mubr.f32.mxu1 %v4317_v7  ;;  %3873 = vmatprep.subr.bf16.mxu0 %v4593_v0 }
  0x48   :  { %3405 = vmatmul.mubr.msk.f32.gmra.mrb[10].mxu1 %vm49_vm0, %v4612_v4  ;;  %3897 = vmatprep.subr.bf16.mxu1 %v4469_v35  ;;  %v4794_v35 = vrot.slane %v27_v21, %v517_v24 }
  0x49   :  { %3399 = vmatmul.mubr.msk.f32.gmra.mrb[6].mxu0 %vm49_vm0, %v865_v12  ;;  %3899 = vmatpush1.bf16.msra.mxu1 %v4497_v42  ;;  %v3421_v42 = vld [vmem:[%s5692_s3 + $0xf8] sm:$0xff] }
  0x4a   :  { %3875 = vmatpush1.bf16.msra.mxu0 %v4614_v5  ;;  %1369 = vmatprep.mubr.f32.mxu0 %v4317_v7 }
  0x4b   :  { %1630 = vmatprep.mubr.f32.mxu1 %v4317_v7  ;;  %3901 = vmatprep.subr.bf16.mxu1 %v4501_v43  ;;  %v3423_v43 = vld [vmem:[%s5692_s3 + $0x108] sm:$0xff] }
  0x4c   :  { %3406 = vmatmul.mubr.msk.f32.vlgmr.msra.gmra.mrb[8].mxu1 %vm49_vm0, %v864_v11  ;;  %3917 = vmatprep.subr.bf16.mxu0 %v3916_v25  ;;  %v3924_v45 = vpack.c.bf16 %v3423_v43, %v3421_v42 }
  0x4d   :  { %3400 = vmatmul.mubr.msk.f32.vlgmr.msra.gmra.mrb[4].mxu0 %vm49_vm0, %v1297_v3  ;;  %3903 = vmatpush1.bf16.msra.mxu1 %v4527_v49 }
  0x4e   :  { %1375 = vmatprep.mubr.f32.mxu0 %v4317_v7  ;;  %1636 = vmatprep.mubr.f32.mxu1 %v4317_v7 }
  0x4f   :  { %3905 = vmatprep.subr.bf16.mxu1 %v4531_v50  ;;  %3919 = vmatpush1.bf16.msra.mxu0 %v3918_v28  ;;  %v3420_v50 = vld [vmem:[%s5692_s3 + $0xf0] sm:$0xff] }
  0x50   :  { %3407 = vmatmul.mubr.msk.f32.gmra.mrb[10].mxu1 %vm49_vm0, %v865_v12  ;;  %3921 = vmatprep.subr.bf16.mxu0 %v3920_v36  ;;  %v3926_v53 = vpack.c.bf16 %v3422_v51, %v3420_v50 }
  0x51   :  { %3401 = vmatmul.mubr.msk.f32.gmra.mrb[6].mxu0 %vm49_vm0, %v1298_v8  ;;  %3907 = vmatpush1.bf16.msra.mxu1 %v4558_v56  ;;  %v3427_v56 = vld [vmem:[%s5692_s3 + $0x128] sm:$0xff] }
  0x52   :  { %1711 = vmatprep.mubr.f32.mxu1 %v4317_v7  ;;  %3909 = vmatprep.subr.bf16.mxu1 %v4562_v57  ;;  %v3928_v60 = vpack.c.bf16 %v3427_v56, %v3425_v55 }
  0x53   :  { %1969 = vmatprep.mubr.f32.mxu0 %v4317_v7  ;;  %3923 = vmatpush1.bf16.msra.mxu0 %v3922_v40 }
  0x54   :  { %3408 = vmatmul.mubr.msk.f32.vlgmr.msra.gmra.mrb[8].mxu1 %vm49_vm0, %v1297_v3  ;;  %3925 = vmatprep.subr.bf16.mxu0 %v3924_v45 }
  0x55   :  { %3911 = vmatpush1.bf16.msra.mxu1 %v4589_v63  ;;  %1717 = vmatprep.mubr.f32.mxu1 %v4317_v7  ;;  %v3930_v63 = vpack.c.bf16 %v3426_v62, %v3424_v61 }
  0x56   :  { %3913 = vmatprep.subr.bf16.mxu1 %v4593_v0  ;;  %v3429_v0 = vld [vmem:[%s5692_s3 + $0x138] sm:$0xff] }
  0x57   :  { %3927 = vmatpush1.bf16.msra.mxu0 %v3926_v53  ;;  %v3932_v4 = vpack.c.bf16 %v3431_v1, %v3429_v0 }
  0x58   :  { %3409 = vmatmul.mubr.msk.f32.gmra.mrb[10].mxu1 %vm49_vm0, %v1298_v8  ;;  %3929 = vmatprep.subr.bf16.mxu0 %v3928_v60 }
  0x59   :  { %3915 = vmatpush1.bf16.msra.mxu1 %v4614_v5  ;;  %1800 = vmatprep.mubr.f32.mxu1 %v4317_v7  ;;  %v3428_v5 = vld [vmem:[%s5692_s3 + $0x130] sm:$0xff] }
  0x5a   :  { %4017 = vmatprep.subr.bf16.mxu1 %v3916_v25  ;;  %v3934_v10 = vpack.c.bf16 %v3430_v6, %v3428_v5  ;;  %v1847_v25 = vld [vmem:[%s5692_s3 + $0x8] sm:$0xff] }
  0x5b   :  { %3931 = vmatpush1.bf16.msra.mxu0 %v3930_v63  ;;  %v3936_v27 = vpack.c.bf16 %v1849_v26, %v1847_v25 }
  0x5c   :  { %3410 = vmatmul.mubr.msk.f32.vlgmr.msra.gmra.mrb[8].mxu1 %vm49_vm0, %v1728_v9  ;;  %3933 = vmatprep.subr.bf16.mxu0 %v3932_v4  ;;  %v3433_v9 = vld [vmem:[%s5692_s3 + $0x158] sm:$0xf] }
  0x5d   :  { %1806 = vmatprep.mubr.f32.mxu1 %v4317_v7  ;;  %4019 = vmatpush1.bf16.msra.mxu1 %v3918_v28 }
  0x5e   :  { %4021 = vmatprep.subr.bf16.mxu1 %v3920_v36 }
  0x5f   :  { %3935 = vmatpush1.bf16.msra.mxu0 %v3934_v10 }
  0x60   :  { %3411 = vmatmul.mubr.msk.f32.gmra.mrb[10].mxu1 %vm49_vm0, %v1729_v13  ;;  %3434 = vmatprep.subr.msk.mxu0 %vm1898_vm1, %v3433_v9 }
  0x61   :  { %2525 = vmatprep.mubr.f32.mxu1 %v4317_v7  ;;  %4023 = vmatpush1.bf16.msra.mxu1 %v3922_v40 }
  0x62   :  { %4025 = vmatprep.subr.bf16.mxu1 %v3924_v45 }
  0x65   :  { %4027 = vmatpush1.bf16.msra.mxu1 %v3926_v53 }
  0x66   :  { %4029 = vmatprep.subr.bf16.mxu1 %v3928_v60 }
  0x69   :  { %4031 = vmatpush1.bf16.msra.mxu1 %v3930_v63 }
  0x6a   :  { %4033 = vmatprep.subr.bf16.mxu1 %v3932_v4 }
  0x6d   :  { %4035 = vmatpush1.bf16.msra.mxu1 %v3934_v10 }
  0x6e   :  { %3520 = vmatprep.subr.msk.mxu1 %vm1898_vm1, %v3433_v9 }
  0xdf   :  { %v122_v14 = vpop.f32.mrb[0].mxu1 }
  0xe0   :  { %v124_v15 = vpop.f32.mrb[1].mxu1 }
  0xe3   :  { %v128_v16 = vpop.f32.mrb[2].mxu1 }
  0xe4   :  { %v130_v17 = vpop.f32.mrb[3].mxu1 }
  0xf8   :  { %v495_v30 = vpop.f32.mrb[0].mxu0 }
  0xf9   :  { %v4191_v33 = vadd.f32 %v495_v30, %v122_v14  ;;  %v497_v34 = vpop.f32.mrb[1].mxu0  ;;  %v3432_v14 = vld [vmem:[%s5692_s3 + $0x150] sm:$0xf] }
  0xfa   :  { %v4192_v39 = vadd.f32 %v497_v34, %v124_v15  ;;  %3521 = vmatpush1.msk.msra.mxu1 %vm1898_vm1, %v3432_v14  ;;  %3435 = vmatpush1.msk.msra.mxu0 %vm1898_vm1, %v3432_v14 }
  0xfb   :  { %v4803_v41 = vadd.f32 %v4191_v33, %v4784_v29  ;;  %4037 = vmatprep.subr.bf16.mxu1 %v3936_v27  ;;  %3937 = vmatprep.subr.bf16.mxu0 %v3936_v27 }
  0xfc   :  { %v501_v44 = vpop.f32.mrb[2].mxu0  ;;  %v522_v46 = vadd.f32 %v4192_v39, %v4794_v35 }
  0xfd   :  { %v4193_v47 = vadd.f32 %v501_v44, %v128_v16  ;;  %v503_v48 = vpop.f32.mrb[3].mxu0  ;;  %v525_v49 = vmax.f32 %v4803_v41, 0.0  ;;  %v1851_v41 = vld [vmem:[%s5692_s3 + $0x28] sm:$0xff] }
  0xfe   :  { %v4194_v52 = vadd.f32 %v503_v48, %v130_v17  ;;  %v526_v57 = vmax.f32 %v522_v46, 0.0 }
  0xff   :  { %533 = vrot.lane.b32.xlu0 %v525_v49, %s4318_s20  ;;  %v4823_v54 = vadd.f32 %v4193_v47, %v4784_v29 }
 0x100   :  { %v524_v58 = vadd.f32 %v4194_v52, %v4794_v35 }
 0x101   :  { %v527_v59 = vmax.f32 %v4823_v54, 0.0 }
 0x102   :  { %v528_v2 = vmax.f32 %v524_v58, 0.0 }
 0x103   :  { %537 = vrot.lane.b32.xlu1 %v527_v59, %s4318_s20  ;;  %535 = vrot.lane.b32.xlu0 %v526_v57, %s4318_s20 }
 0x107   :  { %539 = vrot.lane.b32.xlu1 %v528_v2, %s4318_s20  ;;  %v938_v11 = vpop.f32.mrb[4].mxu1 }
 0x108   :  { %v4857_v12 = vadd.f32 %v938_v11, %v4784_v29  ;;  %v940_v3 = vpop.f32.mrb[5].mxu1 }
 0x109   :  { %v954_v8 = vadd.f32 %v940_v3, %v4794_v35 }
 0x10a   :  { %v957_v13 = vmax.f32 %v4857_v12, 0.0  ;;  %v1846_v12 = vld [vmem:[%s5692_s3] sm:$0xff] }
 0x10b   :  { %v958_v15 = vmax.f32 %v954_v8, 0.0  ;;  %v944_v16 = vpop.f32.mrb[6].mxu1  ;;  %v1848_v8 = vld [vmem:[%s5692_s3 + $0x10] sm:$0xff] }
 0x10c   :  { %v4870_v17 = vadd.f32 %v944_v16, %v4784_v29  ;;  %v946_v18 = vpop.f32.mrb[7].mxu1  ;;  %965 = vrot.lane.b32.xlu0 %v957_v13, %s4318_s20  ;;  %v4950_v54 = vpack.c.bf16 %v1848_v8, %v1846_v12 }
 0x10d   :  { %v956_v21 = vadd.f32 %v946_v18, %v4794_v35  ;;  %967 = vrot.lane.b32.xlu1 %v958_v15, %s4318_s20  ;;  %v1852_v18 = vld [vmem:[%s5692_s3 + $0x30] sm:$0xff] }
 0x10e   :  { %v959_v22 = vmax.f32 %v4870_v17, 0.0  ;;  %v1850_v17 = vld [vmem:[%s5692_s3 + $0x20] sm:$0xff] }
 0x10f   :  { %v960_v23 = vmax.f32 %v956_v21, 0.0  ;;  %v4986_v26 = vpack.c.bf16 %v1852_v18, %v1850_v17 }
 0x110   :  { %969 = vrot.lane.b32.xlu0 %v959_v22, %s4318_s20 }
 0x111   :  { %971 = vrot.lane.b32.xlu1 %v960_v23, %s4318_s20  ;;  %v1857_v23 = vld [vmem:[%s5692_s3 + $0x58] sm:$0xff] }
 0x120   :  { %v1371_v28 = vpop.f32.mrb[4].mxu0 }
 0x121   :  { %v4889_v30 = vadd.f32 %v1371_v28, %v4784_v29  ;;  %v1373_v31 = vpop.f32.mrb[5].mxu0  ;;  %v1854_v28 = vld [vmem:[%s5692_s3 + $0x40] sm:$0xff] }
 0x122   :  { %v1387_v32 = vadd.f32 %v1373_v31, %v4794_v35  ;;  %v1856_v31 = vld [vmem:[%s5692_s3 + $0x50] sm:$0xff] }
 0x123   :  { %v1390_v33 = vmax.f32 %v4889_v30, 0.0  ;;  %v3448_v30 = vld [vmem:[%s5692_s3 + $0x190] sm:$0xff] }
 0x124   :  { %v1391_v34 = vmax.f32 %v1387_v32, 0.0  ;;  %v1377_v36 = vpop.f32.mrb[6].mxu0  ;;  %v1859_v32 = vld [vmem:[%s5692_s3 + $0x68] sm:$0xff] }
 0x125   :  { %v1379_v37 = vpop.f32.mrb[7].mxu0  ;;  %1398 = vrot.lane.b32.xlu0 %v1390_v33, %s4318_s20  ;;  %v4902_v43 = vadd.f32 %v1377_v36, %v4784_v29  ;;  %v5006_v36 = vpack.c.bf16 %v1856_v31, %v1854_v28  ;;  %v3450_v28 = vld [vmem:[%s5692_s3 + $0x1a0] sm:$0xff] }
 0x126   :  { %1400 = vrot.lane.b32.xlu1 %v1391_v34, %s4318_s20  ;;  %v1389_v45 = vadd.f32 %v1379_v37, %v4794_v35  ;;  %v1861_v34 = vld [vmem:[%s5692_s3 + $0x78] sm:$0xff] }
 0x127   :  { %v1392_v50 = vmax.f32 %v4902_v43, 0.0  ;;  %v5010_v37 = vpack.c.bf16 %v1861_v34, %v1859_v32  ;;  %v3457_v32 = vld [vmem:[%s5692_s3 + $0x1d8] sm:$0xff]  ;;  %v3454_v43 = vld [vmem:[%s5692_s3 + $0x1c0] sm:$0xff] }
 0x128   :  { %v1393_v52 = vmax.f32 %v1389_v45, 0.0  ;;  %v1865_v45 = vld [vmem:[%s5692_s3 + $0x98] sm:$0xff] }
 0x12f   :  { %v1802_v38 = vpop.f32.mrb[8].mxu1 }
 0x130   :  { %v4898_v39 = vadd.f32 %v1802_v38, %v4784_v29  ;;  %v1804_v40 = vpop.f32.mrb[9].mxu1  ;;  %v1858_v38 = vld [vmem:[%s5692_s3 + $0x60] sm:$0xff] }
 0x131   :  { %v1818_v42 = vadd.f32 %v1804_v40, %v4794_v35  ;;  %v1860_v40 = vld [vmem:[%s5692_s3 + $0x70] sm:$0xff] }
 0x132   :  { %v1821_v44 = vmax.f32 %v4898_v39, 0.0  ;;  %v3453_v39 = vld [vmem:[%s5692_s3 + $0x1b8] sm:$0xff] }
 0x133   :  { %v1822_v46 = vmax.f32 %v1818_v42, 0.0  ;;  %v1808_v47 = vpop.f32.mrb[10].mxu1  ;;  %v1863_v42 = vld [vmem:[%s5692_s3 + $0x88] sm:$0xff] }
 0x134   :  { %v1810_v48 = vpop.f32.mrb[11].mxu1  ;;  %1829 = vrot.lane.b32.xlu0 %v1821_v44, %s4318_s20  ;;  %v4912_v51 = vadd.f32 %v1808_v47, %v4784_v29  ;;  %v5028_v47 = vpack.c.bf16 %v1865_v45, %v1863_v42 }
 0x135   :  { %1831 = vrot.lane.b32.xlu1 %v1822_v46, %s4318_s20  ;;  %v1820_v53 = vadd.f32 %v1810_v48, %v4794_v35  ;;  %v5025_v46 = vpack.c.bf16 %v1860_v40, %v1858_v38  ;;  %v1862_v48 = vld [vmem:[%s5692_s3 + $0x80] sm:$0xff] }
 0x136   :  { %v1823_v55 = vmax.f32 %v4912_v51, 0.0  ;;  %v3459_v51 = vld [vmem:[%s5692_s3 + $0x1e8] sm:$0xff] }
 0x137   :  { %v1824_v56 = vmax.f32 %v1820_v53, 0.0 }
 0x138   :  { %1402 = vrot.lane.b32.xlu0 %v1392_v50, %s4318_s20 }
 0x139   :  { %1404 = vrot.lane.b32.xlu1 %v1393_v52, %s4318_s20  ;;  %v1864_v52 = vld [vmem:[%s5692_s3 + $0x90] sm:$0xff] }
 0x13a   :  { %v5037_v53 = vpack.c.bf16 %v1864_v52, %v1862_v48  ;;  %v3458_v48 = vld [vmem:[%s5692_s3 + $0x1e0] sm:$0xff]  ;;  %v3460_v52 = vld [vmem:[%s5692_s3 + $0x1f0] sm:$0xff] }
 0x13c   :  { %1833 = vrot.lane.b32.xlu0 %v1823_v55, %s4318_s20 }
 0x13d   :  { %1835 = vrot.lane.b32.xlu1 %v1824_v56, %s4318_s20  ;;  %v5043_v56 = vld [vmem:[%s5692_s3 + $0xa8] sm:$0xf] }
 0x171   :  { %v534_v29 = vpop.permute.xlu0 %533 }
 0x175   :  { %v538_v57 = vpop.permute.xlu1 %537  ;;  %v536_v58 = vpop.permute.xlu0 %535 }
 0x176   :  { %v542_v62 = vsel %vm541_vm2, %v534_v29, %v536_v58  ;;  %v3443_v29 = vld [vmem:[%s5692_s3 + $0x168] sm:$0xff]  ;;  %v5057_v58 = vld [vmem:[%s5692_s3 + $0xa0] sm:$0xf] }
 0x177   :  { %v546_v4 = vmax.f32 %v525_v49, %v542_v62  ;;  %v1853_v49 = vld [vmem:[%s5692_s3 + $0x38] sm:$0xff] }
 0x178   :  { %v4960_v16 = vpack.c.bf16 %v1853_v49, %v1851_v41 }
 0x179   :  { %v540_v60 = vpop.permute.xlu1 %539 }
 0x17a   :  { %v543_v1 = vsel %vm541_vm2, %v538_v57, %v540_v60  ;;  %v3445_v57 = vld [vmem:[%s5692_s3 + $0x178] sm:$0xff] }
 0x17b   :  { %v547_v10 = vmax.f32 %v527_v59, %v543_v1  ;;  %v5059_v60 = vpack.c.bf16 %v3445_v57, %v3443_v29  ;;  %v3442_v1 = vld [vmem:[%s5692_s3 + $0x160] sm:$0xff]  ;;  %v3469_v29 = vld [vmem:[%s5692_s3 + $0x218] sm:$0xff] }
 0x17c   :  { %v3470_v57 = vld [vmem:[%s5692_s3 + $0x220] sm:$0xff] }
 0x17e   :  { %v966_v35 = vpop.permute.xlu0 %965 }
 0x17f   :  { %v968_v61 = vpop.permute.xlu1 %967 }
 0x180   :  { %v973_v63 = vsel %vm541_vm2, %v966_v35, %v968_v61 }
 0x181   :  { %v977_v0 = vmax.f32 %v957_v13, %v973_v63 }
 0x182   :  { %v970_v2 = vpop.permute.xlu0 %969 }
 0x183   :  { %v972_v5 = vpop.permute.xlu1 %971  ;;  %v4934_v11 = vmax.f32 %v546_v4, %v977_v0 }
 0x184   :  { %v974_v6 = vsel %vm541_vm2, %v970_v2, %v972_v5  ;;  %v3444_v2 = vld [vmem:[%s5692_s3 + $0x170] sm:$0xff]  ;;  %v3447_v5 = vld [vmem:[%s5692_s3 + $0x188] sm:$0xff] }
 0x185   :  { %v978_v3 = vmax.f32 %v959_v22, %v974_v6  ;;  %v2095_v59 = vrot.slane %v4934_v11, 2  ;;  %v2329_v13 = vrot.slane %v4934_v11, 4  ;;  %v1855_v22 = vld [vmem:[%s5692_s3 + $0x48] sm:$0xff]  ;;  %v3449_v6 = vld [vmem:[%s5692_s3 + $0x198] sm:$0xff]  ;;  %v5082_v8 = vpack.c.bf16 %v3444_v2, %v3442_v1  ;;  %v3472_v1 = vld [vmem:[%s5692_s3 + $0x230] sm:$0xff] }
 0x186   :  { %v4989_v27 = vpack.c.bf16 %v1857_v23, %v1855_v22  ;;  %v3474_v2 = vld [vmem:[%s5692_s3 + $0x240] sm:$0xff] }
 0x187   :  { %v4942_v9 = vmax.f32 %v547_v10, %v978_v3 }
 0x189   :  { %v4955_v14 = vrot.slane %v4942_v9, 2  ;;  %v4958_v15 = vrot.slane %v4942_v9, 4 }
 0x18b   :  { %v4970_v21 = vsel %vm2094_vm4, %v2095_v59, %v4955_v14  ;;  %v4980_v25 = vsel %vm1898_vm1, %v2329_v13, %v4958_v15  ;;  %v5086_v59 = vpack.c.bf16 %v3449_v6, %v3447_v5  ;;  %v3446_v13 = vld [vmem:[%s5692_s3 + $0x180] sm:$0xff]  ;;  %v3479_v5 = vld [vmem:[%s5692_s3 + $0x268] sm:$0xff] }
 0x18c   :  { %3522 = vmatmul.mubr.msk.f32.vlgmr.msra.gmra.mrb[12].mxu1 %vm1891_vm3, %v4970_v21  ;;  %v5107_v18 = vpack.c.bf16 %v3448_v30, %v3446_v13  ;;  %v3482_v13 = vld [vmem:[%s5692_s3 + $0x280] sm:$0xff]  ;;  %v3485_v30 = vld [vmem:[%s5692_s3 + $0x298] sm:$0xff] }
 0x18d   :  { %2531 = vmatprep.mubr.f32.mxu1 %v4317_v7  ;;  %4039 = vmatpush1.bf16.msra.mxu1 %v4950_v54 }
 0x18e   :  { %4041 = vmatprep.subr.bf16.mxu1 %v4960_v16 }
 0x190   :  { %3523 = vmatmul.mubr.msk.f32.gmra.mrb[14].mxu1 %vm1891_vm3, %v4955_v14 }
 0x191   :  { %4043 = vmatpush1.bf16.msra.mxu1 %v4986_v26  ;;  %2602 = vmatprep.mubr.f32.mxu1 %v4317_v7 }
 0x192   :  { %4045 = vmatprep.subr.bf16.mxu1 %v4989_v27 }
 0x195   :  { %4047 = vmatpush1.bf16.msra.mxu1 %v5006_v36 }
 0x196   :  { %4049 = vmatprep.subr.bf16.mxu1 %v5010_v37 }
 0x197   :  { %v1399_v35 = vpop.permute.xlu0 %1398 }
 0x198   :  { %v1401_v61 = vpop.permute.xlu1 %1400 }
 0x199   :  { %4051 = vmatpush1.bf16.msra.mxu1 %v5025_v46  ;;  %v1406_v62 = vsel %vm541_vm2, %v1399_v35, %v1401_v61 }
 0x19a   :  { %4053 = vmatprep.subr.bf16.mxu1 %v5028_v47  ;;  %v1410_v10 = vmax.f32 %v1390_v33, %v1406_v62  ;;  %v3451_v33 = vld [vmem:[%s5692_s3 + $0x1a8] sm:$0xff] }
 0x19b   :  { %v5111_v23 = vpack.c.bf16 %v3453_v39, %v3451_v33  ;;  %v3487_v33 = vld [vmem:[%s5692_s3 + $0x2a8] sm:$0xff] }
 0x19d   :  { %4055 = vmatpush1.bf16.msra.mxu1 %v5037_v53 }
 0x19e   :  { %3524 = vmatprep.subr.msk.mxu1 %vm1898_vm1, %v5043_v56 }
 0x1a1   :  { %3525 = vmatpush1.msk.msra.mxu1 %vm1898_vm1, %v5057_v58 }
 0x1a2   :  { %4057 = vmatprep.subr.bf16.mxu1 %v5059_v60 }
 0x1a6   :  { %v1830_v63 = vpop.permute.xlu0 %1829 }
 0x1a7   :  { %v1832_v0 = vpop.permute.xlu1 %1831 }
 0x1a8   :  { %v1837_v4 = vsel %vm541_vm2, %v1830_v63, %v1832_v0  ;;  %v3473_v0 = vld [vmem:[%s5692_s3 + $0x238] sm:$0xff] }
 0x1a9   :  { %v1841_v3 = vmax.f32 %v1821_v44, %v1837_v4 }
 0x1aa   :  { %v1403_v12 = vpop.permute.xlu0 %1402 }
 0x1ab   :  { %v5084_v41 = vmax.f32 %v1410_v10, %v1841_v3  ;;  %v1405_v49 = vpop.permute.xlu1 %1404  ;;  %v3476_v10 = vld [vmem:[%s5692_s3 + $0x250] sm:$0xff]  ;;  %v3478_v3 = vld [vmem:[%s5692_s3 + $0x260] sm:$0xff] }
 0x1ac   :  { %v1407_v44 = vsel %vm541_vm2, %v1403_v12, %v1405_v49  ;;  %v3481_v12 = vld [vmem:[%s5692_s3 + $0x278] sm:$0xff] }
 0x1ad   :  { %3436 = vmatmul.mubr.msk.f32.vlgmr.msra.gmra.mrb[8].mxu0 %vm1891_vm3, %v5084_v41  ;;  %3526 = vmatmul.mubr.msk.f32.vlgmr.msra.gmra.mrb[12].mxu1 %vm1891_vm3, %v5084_v41  ;;  %v1411_v34 = vmax.f32 %v1392_v50, %v1407_v44  ;;  %v3456_v50 = vld [vmem:[%s5692_s3 + $0x1d0] sm:$0xff]  ;;  %v2212_v62 = vrot.slane %v5084_v41, 2  ;;  %v5304_v44 = vpack.c.bf16 %v3487_v33, %v3485_v30 }
 0x1ae   :  { %3939 = vmatpush1.bf16.msra.mxu0 %v4950_v54  ;;  %4059 = vmatpush1.bf16.msra.mxu1 %v5082_v8  ;;  %v1834_v17 = vpop.permute.xlu0 %1833  ;;  %v3452_v54 = vld [vmem:[%s5692_s3 + $0x1b0] sm:$0xff] }
 0x1af   :  { %v1836_v22 = vpop.permute.xlu1 %1835  ;;  %3941 = vmatprep.subr.bf16.mxu0 %v4960_v16  ;;  %4061 = vmatprep.subr.bf16.mxu1 %v5086_v59  ;;  %v3455_v16 = vld [vmem:[%s5692_s3 + $0x1c8] sm:$0xff]  ;;  %v5134_v40 = vpack.c.bf16 %v3452_v54, %v3450_v28  ;;  %v3497_v54 = vld [vmem:[%s5692_s3 + $0x2d8] sm:$0xff] }
 0x1b0   :  { %v1838_v31 = vsel %vm541_vm2, %v1834_v17, %v1836_v22  ;;  %1975 = vmatprep.mubr.f32.mxu0 %v4317_v7  ;;  %2608 = vmatprep.mubr.f32.mxu1 %v4317_v7  ;;  %v5140_v45 = vpack.c.bf16 %v3457_v32, %v3455_v16  ;;  %v3484_v17 = vld [vmem:[%s5692_s3 + $0x290] sm:$0xff]  ;;  %v3495_v28 = vld [vmem:[%s5692_s3 + $0x2c8] sm:$0xff] }
 0x1b1   :  { %v1842_v38 = vmax.f32 %v1823_v55, %v1838_v31  ;;  %v3461_v55 = vld [vmem:[%s5692_s3 + $0x1f8] sm:$0xff]  ;;  %v3494_v31 = vld [vmem:[%s5692_s3 + $0x2c0] sm:$0xff]  ;;  %v3496_v16 = vld [vmem:[%s5692_s3 + $0x2d0] sm:$0xff] }
 0x1b2   :  { %3943 = vmatpush1.bf16.msra.mxu0 %v4986_v26  ;;  %4063 = vmatpush1.bf16.msra.mxu1 %v5107_v18  ;;  %v5160_v26 = vpack.c.bf16 %v3456_v50, %v3454_v43  ;;  %v5344_v32 = vld [vmem:[%s5692_s3 + $0x2b0] sm:$0xf]  ;;  %v3498_v43 = vld [vmem:[%s5692_s3 + $0x2e0] sm:$0xff] }
 0x1b3   :  { %v5136_v42 = vmax.f32 %v1411_v34, %v1842_v38  ;;  %3945 = vmatprep.subr.bf16.mxu0 %v4989_v27  ;;  %4065 = vmatprep.subr.bf16.mxu1 %v5111_v23  ;;  %v5164_v27 = vpack.c.bf16 %v3461_v55, %v3459_v51  ;;  %v5346_v34 = vpack.c.bf16 %v3497_v54, %v3495_v28  ;;  %v3500_v50 = vld [vmem:[%s5692_s3 + $0x2f0] sm:$0xff]  ;;  %v3503_v51 = vld [vmem:[%s5692_s3 + $0x308] sm:$0xff]  ;;  %v3505_v55 = vld [vmem:[%s5692_s3 + $0x318] sm:$0xff] }
 0x1b4   :  { %v5348_v38 = vpack.c.bf16 %v3496_v16, %v3494_v31  ;;  %v2900_v28 = vld [vmem:[%s5694_s5 + $0x38] sm:$0xff]  ;;  %v3546_v31 = vld [vmem:[%s5694_s5 + $0x80] sm:$0xff]  ;;  %v3547_v16 = vld [vmem:[%s5694_s5 + $0x88] sm:$0xff] }
 0x1b5   :  { %3437 = vmatmul.mubr.msk.f32.gmra.mrb[10].mxu0 %vm1891_vm3, %v5136_v42  ;;  %3527 = vmatmul.mubr.msk.f32.gmra.mrb[14].mxu1 %vm1891_vm3, %v5136_v42  ;;  %v5200_v35 = vrot.slane %v5136_v42, 2 }
 0x1b6   :  { %3947 = vmatpush1.bf16.msra.mxu0 %v5006_v36  ;;  %4067 = vmatpush1.bf16.msra.mxu1 %v5134_v40  ;;  %v5176_v36 = vpack.c.bf16 %v3460_v52, %v3458_v48  ;;  %v3502_v48 = vld [vmem:[%s5692_s3 + $0x300] sm:$0xff]  ;;  %v3504_v52 = vld [vmem:[%s5692_s3 + $0x310] sm:$0xff] }
 0x1b7   :  { %3949 = vmatprep.subr.bf16.mxu0 %v5010_v37  ;;  %4069 = vmatprep.subr.bf16.mxu1 %v5140_v45  ;;  %v5183_v37 = vld [vmem:[%s5692_s3 + $0x208] sm:$0xf]  ;;  %v5237_v4 = vsel %vm2094_vm4, %v2212_v62, %v5200_v35 }
 0x1b8   :  { %2058 = vmatprep.mubr.f32.mxu0 %v4317_v7  ;;  %2679 = vmatprep.mubr.f32.mxu1 %v4317_v7 }
 0x1ba   :  { %3951 = vmatpush1.bf16.msra.mxu0 %v5025_v46  ;;  %4071 = vmatpush1.bf16.msra.mxu1 %v5160_v26  ;;  %v3471_v46 = vld [vmem:[%s5692_s3 + $0x228] sm:$0xff] }
 0x1bb   :  { %3953 = vmatprep.subr.bf16.mxu0 %v5028_v47  ;;  %4073 = vmatprep.subr.bf16.mxu1 %v5164_v27  ;;  %v3468_v47 = vld [vmem:[%s5692_s3 + $0x210] sm:$0xff]  ;;  %v5211_v61 = vpack.c.bf16 %v3471_v46, %v3469_v29  ;;  %v4006_v29 = vpack.c.bf16 %v3504_v52, %v3502_v48  ;;  %v3506_v46 = vld [vmem:[%s5692_s3 + $0x320] sm:$0xff] }
 0x1bc   :  { %v5214_v63 = vpack.c.bf16 %v3470_v57, %v3468_v47  ;;  %v3508_v47 = vld [vmem:[%s5692_s3 + $0x330] sm:$0xff]  ;;  %v3511_v57 = vld [vmem:[%s5692_s3 + $0x348] sm:$0xff] }
 0x1be   :  { %3955 = vmatpush1.bf16.msra.mxu0 %v5037_v53  ;;  %4075 = vmatpush1.bf16.msra.mxu1 %v5176_v36  ;;  %v5209_v53 = vld [vmem:[%s5692_s3 + $0x200] sm:$0xf] }
 0x1bf   :  { %3438 = vmatprep.subr.msk.mxu0 %vm1898_vm1, %v5043_v56  ;;  %3528 = vmatprep.subr.msk.mxu1 %vm1898_vm1, %v5183_v37  ;;  %v3475_v56 = vld [vmem:[%s5692_s3 + $0x248] sm:$0xff] }
 0x1c2   :  { %3439 = vmatpush1.msk.msra.mxu0 %vm1898_vm1, %v5057_v58  ;;  %3529 = vmatpush1.msk.msra.mxu1 %vm1898_vm1, %v5209_v53  ;;  %v3477_v58 = vld [vmem:[%s5692_s3 + $0x258] sm:$0xff] }
 0x1c3   :  { %3440 = vmatmul.mubr.msk.f32.vlgmr.msra.gmra.mrb[8].mxu0 %vm1891_vm3, %v4934_v11  ;;  %3957 = vmatprep.subr.bf16.mxu0 %v5059_v60  ;;  %v5248_v11 = vpack.c.bf16 %v3475_v56, %v3473_v0  ;;  %v5252_v60 = vpack.c.bf16 %v3474_v2, %v3472_v1  ;;  %v5256_v6 = vpack.c.bf16 %v3479_v5, %v3477_v58  ;;  %v3512_v0 = vld [vmem:[%s5692_s3 + $0x350] sm:$0xff]  ;;  %v3515_v1 = vld [vmem:[%s5692_s3 + $0x368] sm:$0xf]  ;;  %v2778_v2 = vrot.slane %v5136_v42, 4  ;;  %v3514_v58 = vld [vmem:[%s5692_s3 + $0x360] sm:$0xf] }
 0x1c4   :  { %3530 = vmatmul.mubr.msk.f32.vlgmr.msra.gmra.mrb[12].mxu1 %vm1891_vm3, %v5237_v4  ;;  %4077 = vmatprep.subr.bf16.mxu1 %v5211_v61  ;;  %v2777_v5 = vrot.slane %v5084_v41, 4  ;;  %v2893_v41 = vld [vmem:[%s5694_s5] sm:$0xff] }
 0x1c5   :  { %3959 = vmatpush1.bf16.msra.mxu0 %v5082_v8  ;;  %4079 = vmatpush1.bf16.msra.mxu1 %v5214_v63  ;;  %v3483_v8 = vld [vmem:[%s5692_s3 + $0x288] sm:$0xff] }
 0x1c6   :  { %2064 = vmatprep.mubr.f32.mxu0 %v4317_v7  ;;  %2685 = vmatprep.mubr.f32.mxu1 %v4317_v7  ;;  %v5282_v49 = vpack.c.bf16 %v3483_v8, %v3481_v12  ;;  %v2779_v42 = vsel %vm1898_vm1, %v2777_v5, %v2778_v2  ;;  %v3543_v12 = vld [vmem:[%s5694_s5 + $0x68] sm:$0xff] }
 0x1c7   :  { %3441 = vmatmul.mubr.msk.f32.gmra.mrb[10].mxu0 %vm1891_vm3, %v4942_v9  ;;  %3961 = vmatprep.subr.bf16.mxu0 %v5086_v59  ;;  %v5278_v9 = vpack.c.bf16 %v3478_v3, %v3476_v10  ;;  %v3480_v59 = vld [vmem:[%s5692_s3 + $0x270] sm:$0xff]  ;;  %v3542_v3 = vld [vmem:[%s5694_s5 + $0x60] sm:$0xff] }
 0x1c8   :  { %3531 = vmatmul.mubr.msk.f32.gmra.mrb[14].mxu1 %vm1891_vm3, %v5200_v35  ;;  %4081 = vmatprep.subr.bf16.mxu1 %v5248_v11  ;;  %v5300_v39 = vpack.c.bf16 %v3482_v13, %v3480_v59  ;;  %v2898_v59 = vld [vmem:[%s5694_s5 + $0x28] sm:$0xff] }
 0x1c9   :  { %3963 = vmatpush1.bf16.msra.mxu0 %v5107_v18  ;;  %4083 = vmatpush1.bf16.msra.mxu1 %v5252_v60  ;;  %v3486_v18 = vld [vmem:[%s5692_s3 + $0x2a0] sm:$0xff] }
 0x1ca   :  { %3965 = vmatprep.subr.bf16.mxu0 %v5111_v23  ;;  %4085 = vmatprep.subr.bf16.mxu1 %v5256_v6  ;;  %v5314_v22 = vpack.c.bf16 %v3486_v18, %v3484_v17  ;;  %v5321_v23 = vld [vmem:[%s5692_s3 + $0x2b8] sm:$0xf]  ;;  %v3544_v17 = vld [vmem:[%s5694_s5 + $0x70] sm:$0xff] }
 0x1cb   :  { %2172 = vmatprep.mubr.f32.mxu0 %v4317_v7  ;;  %2760 = vmatprep.mubr.f32.mxu1 %v4317_v7  ;;  %v3545_v18 = vld [vmem:[%s5694_s5 + $0x78] sm:$0xff] }
 0x1cd   :  { %3967 = vmatpush1.bf16.msra.mxu0 %v5134_v40  ;;  %4087 = vmatpush1.bf16.msra.mxu1 %v5278_v9  ;;  %v3499_v40 = vld [vmem:[%s5692_s3 + $0x2e8] sm:$0xff] }
 0x1ce   :  { %3969 = vmatprep.subr.bf16.mxu0 %v5140_v45  ;;  %4089 = vmatprep.subr.bf16.mxu1 %v5282_v49  ;;  %v3501_v45 = vld [vmem:[%s5692_s3 + $0x2f8] sm:$0xff] }
 0x1d1   :  { %3971 = vmatpush1.bf16.msra.mxu0 %v5160_v26  ;;  %4091 = vmatpush1.bf16.msra.mxu1 %v5300_v39  ;;  %v4000_v26 = vpack.c.bf16 %v3501_v45, %v3499_v40  ;;  %v2902_v40 = vld [vmem:[%s5694_s5 + $0x48] sm:$0xff] }
 0x1d2   :  { %3973 = vmatprep.subr.bf16.mxu0 %v5164_v27  ;;  %4093 = vmatprep.subr.bf16.mxu1 %v5304_v44  ;;  %v4004_v27 = vpack.c.bf16 %v3505_v55, %v3503_v51 }
 0x1d5   :  { %3975 = vmatpush1.bf16.msra.mxu0 %v5176_v36  ;;  %4095 = vmatpush1.bf16.msra.mxu1 %v5314_v22  ;;  %v3507_v36 = vld [vmem:[%s5692_s3 + $0x328] sm:$0xff] }
 0x1d6   :  { %3464 = vmatprep.subr.msk.mxu0 %vm1898_vm1, %v5183_v37  ;;  %3532 = vmatprep.subr.msk.mxu1 %vm1898_vm1, %v5321_v23  ;;  %v3509_v37 = vld [vmem:[%s5692_s3 + $0x338] sm:$0xff] }
 0x1d9   :  { %3465 = vmatpush1.msk.msra.mxu0 %vm1898_vm1, %v5209_v53  ;;  %3533 = vmatpush1.msk.msra.mxu1 %vm1898_vm1, %v5344_v32  ;;  %v3513_v53 = vld [vmem:[%s5692_s3 + $0x358] sm:$0xff] }
 0x1da   :  { %3466 = vmatmul.mubr.msk.f32.vlgmr.msra.gmra.mrb[8].mxu0 %vm1891_vm3, %v4970_v21  ;;  %3977 = vmatprep.subr.bf16.mxu0 %v5211_v61  ;;  %v4002_v21 = vpack.c.bf16 %v3500_v50, %v3498_v43  ;;  %v4010_v61 = vpack.c.bf16 %v3508_v47, %v3506_v46  ;;  %v4012_v62 = vpack.c.bf16 %v3513_v53, %v3511_v57  ;;  %v3548_v43 = vld [vmem:[%s5694_s5 + $0x90] sm:$0xff]  ;;  %v3549_v50 = vld [vmem:[%s5694_s5 + $0x98] sm:$0xff] }
 0x1db   :  { %3534 = vmatmul.mubr.msk.f32.vlgmr.msra.gmra.mrb[12].mxu1 %vm1891_vm3, %v4980_v25  ;;  %4097 = vmatprep.subr.bf16.mxu1 %v5346_v34  ;;  %v4129_v55 = vpack.c.bf16 %v3549_v50, %v3548_v43  ;;  %v3561_v43 = vld [vmem:[%s5694_s5 + $0xe8] sm:$0xff] }
 0x1dc   :  { %3979 = vmatpush1.bf16.msra.mxu0 %v5214_v63  ;;  %4099 = vmatpush1.bf16.msra.mxu1 %v5348_v38  ;;  %v3510_v63 = vld [vmem:[%s5692_s3 + $0x340] sm:$0xff] }
 0x1dd   :  { %2178 = vmatprep.mubr.f32.mxu0 %v4317_v7  ;;  %2766 = vmatprep.mubr.f32.mxu1 %v4317_v7  ;;  %v4014_v56 = vpack.c.bf16 %v3512_v0, %v3510_v63 }
 0x1de   :  { %3467 = vmatmul.mubr.msk.f32.gmra.mrb[10].mxu0 %vm1891_vm3, %v4955_v14  ;;  %3981 = vmatprep.subr.bf16.mxu0 %v5248_v11  ;;  %v4008_v14 = vpack.c.bf16 %v3509_v37, %v3507_v36  ;;  %v4319_v11 = vmov 0.0|0.0  }
 0x1df   :  { %3535 = vmatmul.mubr.msk.f32.gmra.mrb[14].mxu1 %vm1891_vm3, %v4958_v15  ;;  %4101 = vmatprep.subr.bf16.mxu1 %v4000_v26 }
 0x1e0   :  { %3983 = vmatpush1.bf16.msra.mxu0 %v5252_v60  ;;  %4103 = vmatpush1.bf16.msra.mxu1 %v4002_v21  ;;  %v2895_v60 = vld [vmem:[%s5694_s5 + $0x10] sm:$0xff] }
 0x1e1   :  { %3985 = vmatprep.subr.bf16.mxu0 %v5256_v6  ;;  %4105 = vmatprep.subr.bf16.mxu1 %v4004_v27  ;;  %v2896_v6 = vld [vmem:[%s5694_s5 + $0x18] sm:$0xff] }
 0x1e2   :  { %2289 = vmatprep.mubr.f32.mxu0 %v4317_v7  ;;  %2848 = vmatprep.mubr.f32.mxu1 %v4317_v7  ;;  %v4135_v8 = vpack.c.bf16 %v2896_v6, %v2895_v60  ;;  %v3552_v60 = vld [vmem:[%s5694_s5 + $0xa0] sm:$0xff]  ;;  %v3553_v6 = vld [vmem:[%s5694_s5 + $0xa8] sm:$0xff] }
 0x1e4   :  { %3987 = vmatpush1.bf16.msra.mxu0 %v5278_v9  ;;  %4107 = vmatpush1.bf16.msra.mxu1 %v4006_v29  ;;  %v4120_v9 = vpack.c.bf16 %v3543_v12, %v3542_v3  ;;  %v3565_v12 = vld [vmem:[%s5694_s5 + $0x100] sm:$0xff] }
 0x1e5   :  { %3989 = vmatprep.subr.bf16.mxu0 %v5282_v49  ;;  %4109 = vmatprep.subr.bf16.mxu1 %v4008_v14  ;;  %v2897_v49 = vld [vmem:[%s5694_s5 + $0x20] sm:$0xff] }
 0x1e6   :  { %v4138_v13 = vpack.c.bf16 %v2898_v59, %v2897_v49  ;;  %v3554_v59 = vld [vmem:[%s5694_s5 + $0xb0] sm:$0xff] }
 0x1e8   :  { %3991 = vmatpush1.bf16.msra.mxu0 %v5300_v39  ;;  %4111 = vmatpush1.bf16.msra.mxu1 %v4010_v61 }
 0x1e9   :  { %3993 = vmatprep.subr.bf16.mxu0 %v5304_v44  ;;  %4113 = vmatprep.subr.bf16.mxu1 %v4012_v62 }
 0x1ec   :  { %3995 = vmatpush1.bf16.msra.mxu0 %v5314_v22  ;;  %4115 = vmatpush1.bf16.msra.mxu1 %v4014_v56  ;;  %v4123_v22 = vpack.c.bf16 %v3545_v18, %v3544_v17  ;;  %v3556_v17 = vld [vmem:[%s5694_s5 + $0xc0] sm:$0xff]  ;;  %v3557_v18 = vld [vmem:[%s5694_s5 + $0xc8] sm:$0xff] }
 0x1ed   :  { %3490 = vmatprep.subr.msk.mxu0 %vm1898_vm1, %v5321_v23  ;;  %3536 = vmatprep.subr.msk.mxu1 %vm1898_vm1, %v3515_v1  ;;  %v2899_v23 = vld [vmem:[%s5694_s5 + $0x30] sm:$0xff] }
 0x1ee   :  { %v4141_v54 = vpack.c.bf16 %v2900_v28, %v2899_v23  ;;  %v3569_v23 = vld [vmem:[%s5694_s5 + $0x120] sm:$0xff]  ;;  %v3570_v28 = vld [vmem:[%s5694_s5 + $0x128] sm:$0xff] }
 0x1f0   :  { %3491 = vmatpush1.msk.msra.mxu0 %vm1898_vm1, %v5344_v32  ;;  %3537 = vmatpush1.msk.msra.mxu1 %vm1898_vm1, %v3514_v58  ;;  %v4126_v32 = vpack.c.bf16 %v3547_v16, %v3546_v31  ;;  %v3558_v31 = vld [vmem:[%s5694_s5 + $0xd0] sm:$0xff]  ;;  %v3559_v16 = vld [vmem:[%s5694_s5 + $0xd8] sm:$0xff] }
 0x1f1   :  { %3492 = vmatmul.mubr.msk.f32.vlgmr.msra.gmra.mrb[8].mxu0 %vm1891_vm3, %v5237_v4  ;;  %3997 = vmatprep.subr.bf16.mxu0 %v5346_v34  ;;  %v3540_v4 = vld [vmem:[%s5694_s5 + $0x50] sm:$0xff]  ;;  %v1845_v34 = vld [vmem:[%s5693_s4] sm:$0x3] }
 0x1f2   :  { %3538 = vmatmul.mubr.msk.f32.vlgmr.msra.gmra.mrb[12].mxu1 %vm1891_vm3, %v2779_v42  ;;  %3999 = vmatpush1.bf16.msra.mxu0 %v5348_v38  ;;  %v2901_v38 = vld [vmem:[%s5694_s5 + $0x40] sm:$0xff]  ;;  %v2427_v51 = vrot.slane %v1845_v34, %v513_v20 }
 0x1f3   :  { %2295 = vmatprep.mubr.f32.mxu0 %v4317_v7  ;;  %2854 = vmatprep.mubr.f32.mxu1 %v4317_v7  ;;  %v4144_v45 = vpack.c.bf16 %v2902_v40, %v2901_v38  ;;  %v3572_v38 = vld [vmem:[%s5694_s5 + $0x138] sm:$0xff]  ;;  %v4156_v40 = vpack.c.bf16 %v3559_v16, %v3558_v31 }
 0x1f4   :  { %4001 = vmatprep.subr.bf16.mxu0 %v4000_v26  ;;  %4131 = vmatprep.subr.bf16.mxu1 %v4319_v11  ;;  %v2431_v26 = vrot.slane %v1845_v34, %v517_v24  ;;  %v3571_v34 = vld [vmem:[%s5694_s5 + $0x130] sm:$0xff] }
 0x1f5   :  { %3493 = vmatmul.mubr.msk.f32.gmra.mrb[10].mxu0 %vm1891_vm3, %v5200_v35  ;;  %v2894_v35 = vld [vmem:[%s5694_s5 + $0x8] sm:$0xff]  ;;  %v4174_v50 = vpack.c.bf16 %v3572_v38, %v3571_v34 }
 0x1f6   :  { %3539 = vmatmul.mubr.msk.f32.gmra.mrb[14].mxu1 %vm1891_vm3, %v2778_v2  ;;  %4003 = vmatpush1.bf16.msra.mxu0 %v4002_v21 }
 0x1f7   :  { %4005 = vmatprep.subr.bf16.mxu0 %v4004_v27  ;;  %2406 = vmatprep.mubr.f32.mxu0 %v4317_v7 }
 0x1f8   :  { %3684 = vmatprep.mubr.msk.f32.mxu1 %vm4320_vm5, %v4317_v7 }
 0x1fa   :  { %4007 = vmatpush1.bf16.msra.mxu0 %v4006_v29 }
 0x1fb   :  { %4009 = vmatprep.subr.bf16.mxu0 %v4008_v14 }
 0x1fe   :  { %4011 = vmatpush1.bf16.msra.mxu0 %v4010_v61 }
 0x1ff   :  { %4013 = vmatprep.subr.bf16.mxu0 %v4012_v62 }
 0x202   :  { %4015 = vmatpush1.bf16.msra.mxu0 %v4014_v56 }
 0x203   :  { %3516 = vmatprep.subr.msk.mxu0 %vm1898_vm1, %v3515_v1 }
 0x206   :  { %3517 = vmatpush1.msk.msra.mxu0 %vm1898_vm1, %v3514_v58 }
 0x207   :  { %3518 = vmatmul.mubr.msk.f32.vlgmr.msra.gmra.mrb[8].mxu0 %vm1891_vm3, %v4980_v25  ;;  %v4132_v25 = vpack.c.bf16 %v2894_v35, %v2893_v41  ;;  %4116 = vmatprep.subr.bf16.mxu0 %v4319_v11  ;;  %v3563_v41 = vld [vmem:[%s5694_s5 + $0xf0] sm:$0xff]  ;;  %v3564_v35 = vld [vmem:[%s5694_s5 + $0xf8] sm:$0xff] }
 0x208   :  { %2412 = vmatprep.mubr.f32.mxu0 %v4317_v7 }
 0x209   :  { %4133 = vmatpush3.bf16.msra.mxu1 %v4132_v25 }
 0x20a   :  { %4134 = vmatprep.subr.bf16.mxu1 %v4319_v11 }
 0x20b   :  { %3519 = vmatmul.mubr.msk.f32.gmra.mrb[10].mxu0 %vm1891_vm3, %v4958_v15  ;;  %v3541_v15 = vld [vmem:[%s5694_s5 + $0x58] sm:$0xff] }
 0x20c   :  { %v4117_v10 = vpack.c.bf16 %v3541_v15, %v3540_v4  ;;  %3661 = vmatprep.mubr.msk.f32.mxu0 %vm4320_vm5, %v4317_v7 }
 0x20d   :  { %4136 = vmatpush3.bf16.msra.mxu1 %v4135_v8  ;;  %v3566_v8 = vld [vmem:[%s5694_s5 + $0x108] sm:$0xff] }
 0x20e   :  { %4118 = vmatpush3.bf16.msra.mxu0 %v4117_v10  ;;  %4137 = vmatprep.subr.bf16.mxu1 %v4319_v11  ;;  %v4162_v10 = vpack.c.bf16 %v3564_v35, %v3563_v41 }
 0x20f   :  { %4119 = vmatprep.subr.bf16.mxu0 %v4319_v11 }
 0x211   :  { %4139 = vmatpush3.bf16.msra.mxu1 %v4138_v13  ;;  %v3555_v13 = vld [vmem:[%s5694_s5 + $0xb8] sm:$0xff] }
 0x212   :  { %4121 = vmatpush3.bf16.msra.mxu0 %v4120_v9  ;;  %4140 = vmatprep.subr.bf16.mxu1 %v4319_v11  ;;  %v4147_v9 = vpack.c.bf16 %v3553_v6, %v3552_v60 }
 0x213   :  { %4122 = vmatprep.subr.bf16.mxu0 %v4319_v11 }
 0x215   :  { %4142 = vmatpush3.bf16.msra.mxu1 %v4141_v54  ;;  %v4153_v54 = vpack.c.bf16 %v3557_v18, %v3556_v17 }
 0x216   :  { %4124 = vmatpush3.bf16.msra.mxu0 %v4123_v22  ;;  %4143 = vmatprep.subr.bf16.mxu1 %v4319_v11 }
 0x217   :  { %4125 = vmatprep.subr.bf16.mxu0 %v4319_v11 }
 0x219   :  { %4145 = vmatpush3.bf16.msra.mxu1 %v4144_v45  ;;  %v3560_v45 = vld [vmem:[%s5694_s5 + $0xe0] sm:$0xff] }
 0x21a   :  { %4127 = vmatpush3.bf16.msra.mxu0 %v4126_v32  ;;  %4161 = vmatprep.subr.bf16.mxu1 %v4319_v11  ;;  %v4171_v32 = vpack.c.bf16 %v3570_v28, %v3569_v23 }
 0x21b   :  { %4128 = vmatprep.subr.bf16.mxu0 %v4319_v11 }
 0x21e   :  { %4130 = vmatpush3.bf16.msra.mxu0 %v4129_v55  ;;  %v3574_v55 = vld [vmem:[%s5694_s5 + $0x140] sm:$0xff] }
 0x21f   :  { %4146 = vmatprep.subr.bf16.mxu0 %v4319_v11 }
 0x2c5   :  { %v2850_v30 = vpop.f32.mrb[12].mxu1 }
 0x2c6   :  { %v2852_v33 = vpop.f32.mrb[13].mxu1  ;;  %v2865_v20 = vadd.f32 %v2850_v30, %v2427_v51  ;;  %v4165_v30 = vpack.c.bf16 %v3566_v8, %v3565_v12 }
 0x2c7   :  { %v2866_v19 = vadd.f32 %v2852_v33, %v2431_v26  ;;  %v3567_v33 = vld [vmem:[%s5694_s5 + $0x110] sm:$0xff] }
 0x2c8   :  { %v2869_v14 = vmax.f32 %v2865_v20, 0.0  ;;  %v3577_v20 = vld [vmem:[%s5694_s5 + $0x158] sm:$0xff] }
 0x2c9   :  { %v2856_v39 = vpop.f32.mrb[14].mxu1  ;;  %v2870_v47 = vmax.f32 %v2866_v19, 0.0 }
 0x2ca   :  { %v2858_v44 = vpop.f32.mrb[15].mxu1  ;;  %v5544_v53 = vadd.f32 %v2856_v39, %v2427_v51  ;;  %v3568_v39 = vld [vmem:[%s5694_s5 + $0x118] sm:$0xff] }
 0x2cb   :  { %v2868_v62 = vadd.f32 %v2858_v44, %v2431_v26  ;;  %v4150_v44 = vpack.c.bf16 %v3555_v13, %v3554_v59  ;;  %v4168_v22 = vpack.c.bf16 %v3568_v39, %v3567_v33 }
 0x2cc   :  { %v2871_v0 = vmax.f32 %v5544_v53, 0.0 }
 0x2cd   :  { %v2872_v56 = vmax.f32 %v2868_v62, 0.0 }
 0x2da   :  { %v2408_v21 = vpop.f32.mrb[8].mxu0 }
 0x2db   :  { %v2434_v27 = vadd.f32 %v2427_v51, %v2408_v21  ;;  %v2410_v48 = vpop.f32.mrb[9].mxu0 }
 0x2dc   :  { %v2435_v52 = vadd.f32 %v2431_v26, %v2410_v48 }
 0x2dd   :  { %v2438_v36 = vmax.f32 %v2434_v27, 0.0 }
 0x2de   :  { %v2439_v24 = vmax.f32 %v2435_v52, 0.0  ;;  %v2414_v37 = vpop.f32.mrb[10].mxu0  ;;  %v3576_v52 = vld [vmem:[%s5694_s5 + $0x150] sm:$0xff] }
 0x2df   :  { %2446 = vrot.lane.b32.xlu0 %v2438_v36, %s4321_s22  ;;  %v2416_v29 = vpop.f32.mrb[11].mxu0  ;;  %v5542_v46 = vadd.f32 %v2427_v51, %v2414_v37  ;;  %v4159_v51 = vpack.c.bf16 %v3561_v43, %v3560_v45  ;;  %v3578_v37 = vld [vmem:[%s5694_s5 + $0x160] sm:$0xff] }
 0x2e0   :  { %2448 = vrot.lane.b32.xlu1 %v2439_v24, %s4321_s22  ;;  %v2437_v57 = vadd.f32 %v2431_v26, %v2416_v29  ;;  %v3575_v26 = vld [vmem:[%s5694_s5 + $0x148] sm:$0xff] }
 0x2e1   :  { %v2440_v61 = vmax.f32 %v5542_v46, 0.0  ;;  %v4177_v27 = vpack.c.bf16 %v3575_v26, %v3574_v55  ;;  %v3579_v29 = vld [vmem:[%s5694_s5 + $0x168] sm:$0xff] }
 0x2e2   :  { %v2441_v63 = vmax.f32 %v2437_v57, 0.0 }
 0x2e3   :  { %2877 = vrot.lane.b32.xlu0 %v2869_v14, %s4321_s22 }
 0x2e4   :  { %2879 = vrot.lane.b32.xlu1 %v2870_v47, %s4321_s22  ;;  %v3581_v47 = vld [vmem:[%s5694_s5 + $0x178] sm:$0xff] }
 0x2e7   :  { %2450 = vrot.lane.b32.xlu0 %v2440_v61, %s4321_s22 }
 0x2e8   :  { %2452 = vrot.lane.b32.xlu1 %v2441_v63, %s4321_s22 }
 0x2eb   :  { %2881 = vrot.lane.b32.xlu0 %v2871_v0, %s4321_s22 }
 0x2ec   :  { %2883 = vrot.lane.b32.xlu1 %v2872_v56, %s4321_s22  ;;  %v3582_v56 = vld [vmem:[%s5694_s5 + $0x180] sm:$0xff] }
 0x351   :  { %v2447_v1 = vpop.permute.xlu0 %2446 }
 0x352   :  { %v2449_v2 = vpop.permute.xlu1 %2448 }
 0x353   :  { %v2455_v58 = vsel %vm2454_vm6, %v2447_v1, %v2449_v2  ;;  %v3583_v1 = vld [vmem:[%s5694_s5 + $0x188] sm:$0xff] }
 0x354   :  { %v2459_v25 = vmax.f32 %v2438_v36, %v2455_v58  ;;  %v4180_v36 = vpack.c.bf16 %v3577_v20, %v3576_v52 }
 0x355   :  { %v2878_v5 = vpop.permute.xlu0 %2877 }
 0x356   :  { %v2880_v42 = vpop.permute.xlu1 %2879 }
 0x357   :  { %v2885_v4 = vsel %vm2454_vm6, %v2878_v5, %v2880_v42  ;;  %v4189_v5 = vpack.c.bf16 %v3583_v1, %v3582_v56 }
 0x358   :  { %v2889_v15 = vmax.f32 %v2869_v14, %v2885_v4  ;;  %v4183_v14 = vpack.c.bf16 %v3579_v29, %v3578_v37 }
 0x359   :  { %v2451_v19 = vpop.permute.xlu0 %2450 }
 0x35a   :  { %v2891_v3 = vmax.f32 %v2459_v25, %v2889_v15  ;;  %v2453_v24 = vpop.permute.xlu1 %2452 }
 0x35b   :  { %v2456_v58 = vsel %vm2454_vm6, %v2451_v19, %v2453_v24 }
 0x35c   :  { %v2915_v49 = vrot.slane %v2891_v3, 2  ;;  %3685 = vmatmul.mubr.msk.f32.vlgmr.msra.gmra.mrb[16].mxu1 %vm2916_vm7, %v2891_v3  ;;  %v3157_v21 = vrot.slane %v2891_v3, 6  ;;  %v3072_v48 = vrot.slane %v2891_v3, 4  ;;  %v2460_v41 = vmax.f32 %v2440_v61, %v2456_v58 }
 0x35d   :  { %4163 = vmatpush3.bf16.msra.mxu1 %v4162_v10  ;;  %3730 = vmatprep.mubr.msk.f32.mxu1 %vm4320_vm5, %v4317_v7  ;;  %v2882_v57 = vpop.permute.xlu0 %2881 }
 0x35e   :  { %3662 = vmatmul.mubr.msk.f32.vlgmr.msra.gmra.mrb[12].mxu0 %vm2916_vm7, %v2915_v49  ;;  %4164 = vmatprep.subr.bf16.mxu1 %v4319_v11  ;;  %v2884_v62 = vpop.permute.xlu1 %2883 }
 0x35f   :  { %4148 = vmatpush3.bf16.msra.mxu0 %v4147_v9  ;;  %3707 = vmatprep.mubr.msk.f32.mxu0 %vm4320_vm5, %v4317_v7  ;;  %v2886_v2 = vsel %vm2454_vm6, %v2882_v57, %v2884_v62 }
 0x360   :  { %4149 = vmatprep.subr.bf16.mxu0 %v4319_v11  ;;  %v2890_v42 = vmax.f32 %v2871_v0, %v2886_v2 }
 0x361   :  { %4166 = vmatpush3.bf16.msra.mxu1 %v4165_v30 }
 0x362   :  { %4167 = vmatprep.subr.bf16.mxu1 %v4319_v11  ;;  %v2892_v35 = vmax.f32 %v2460_v41, %v2890_v42 }
 0x363   :  { %4151 = vmatpush3.bf16.msra.mxu0 %v4150_v44 }
 0x364   :  { %4152 = vmatprep.subr.bf16.mxu0 %v4319_v11 }
 0x365   :  { %4169 = vmatpush3.bf16.msra.mxu1 %v4168_v22 }
 0x366   :  { %4170 = vmatprep.subr.bf16.mxu1 %v4319_v11 }
 0x367   :  { %4154 = vmatpush3.bf16.msra.mxu0 %v4153_v54 }
 0x368   :  { %4155 = vmatprep.subr.bf16.mxu0 %v4319_v11 }
 0x369   :  { %4172 = vmatpush3.bf16.msra.mxu1 %v4171_v32 }
 0x36a   :  { %4173 = vmatprep.subr.bf16.mxu1 %v4319_v11 }
 0x36b   :  { %4157 = vmatpush3.bf16.msra.mxu0 %v4156_v40 }
 0x36c   :  { %4158 = vmatprep.subr.bf16.mxu0 %v4319_v11 }
 0x36d   :  { %4175 = vmatpush3.bf16.msra.mxu1 %v4174_v50 }
 0x36f   :  { %4160 = vmatpush3.bf16.msra.mxu0 %v4159_v51 }
 0x370   :  { %3731 = vmatmul.mubr.msk.f32.vlgmr.msra.gmra.mrb[18].mxu1 %vm2916_vm7, %v3157_v21  ;;  %4176 = vmatprep.subr.bf16.mxu0 %v4319_v11 }
 0x372   :  { %3708 = vmatmul.mubr.msk.f32.vlgmr.msra.gmra.mrb[14].mxu0 %vm2916_vm7, %v3072_v48 }
 0x373   :  { %4178 = vmatpush3.bf16.msra.mxu0 %v4177_v27  ;;  %3753 = vmatprep.mubr.msk.f32.mxu0 %vm4320_vm5, %v4317_v7  ;;  %v3580_v7 = vld [vmem:[%s5694_s5 + $0x170] sm:$0xff] }
 0x374   :  { %4179 = vmatprep.subr.bf16.mxu0 %v4319_v11  ;;  %v4186_v63 = vpack.c.bf16 %v3581_v47, %v3580_v7 }
 0x377   :  { %4181 = vmatpush3.bf16.msra.mxu0 %v4180_v36 }
 0x378   :  { %4182 = vmatprep.subr.bf16.mxu0 %v4319_v11 }
 0x37b   :  { %4184 = vmatpush3.bf16.msra.mxu0 %v4183_v14 }
 0x37c   :  { %4185 = vmatprep.subr.bf16.mxu0 %v4319_v11 }
 0x37f   :  { %4187 = vmatpush3.bf16.msra.mxu0 %v4186_v63 }
 0x380   :  { %4188 = vmatprep.subr.bf16.mxu0 %v4319_v11  ;;  %v3585_v11 = vld [vmem:[%s5695_s6] ss:$0 sm:$0xff] }
 0x383   :  { %4190 = vmatpush3.bf16.msra.mxu0 %v4189_v5 }
 0x386   :  { %3754 = vmatmul.mubr.msk.f32.vlgmr.msra.gmra.mrb[16].mxu0 %vm2916_vm7, %v2892_v35 }
 0x42f   :  { %v3057_v4 = vpop.f32.mrb[16].mxu1 }
 0x430   :  { %v3686_v25 = vpop.f32.mrb[17].mxu1 }
 0x431   :  { %v2985_v15 = vpop.f32.mrb[12].mxu0 }
 0x432   :  { %v3058_v60 = vadd.f32 %v3057_v4, %v2985_v15  ;;  %v3663_v6 = vpop.f32.mrb[13].mxu0 }
 0x443   :  { %v3226_v10 = vpop.f32.mrb[18].mxu1 }
 0x444   :  { %v3732_v3 = vpop.f32.mrb[19].mxu1 }
 0x445   :  { %v3141_v12 = vpop.f32.mrb[14].mxu0 }
 0x446   :  { %v3145_v8 = vadd.f32 %v3141_v12, %v3058_v60  ;;  %v3709_v53 = vpop.f32.mrb[15].mxu0 }
 0x448   :  { %v3230_v0 = vadd.f32 %v3226_v10, %v3145_v8 }
 0x459   :  { %v3311_v9 = vpop.f32.mrb[16].mxu0 }
 0x45a   :  { %v3315_v46 = vadd.f32 %v3311_v9, %v3230_v0  ;;  %v3755_v61 = vpop.f32.mrb[17].mxu0 }
 0x45c   :  { %v3323_v49 = vadd.f32 %v3585_v11, %v3315_v46 }
 0x45e   :  { %3325 = vst.msk [vmem:[#allocation2] sm:$0x3] %vm3324_vm8, %v3323_v49 }
 0x45f   :  { %4304 = shalt.err (!%p4301_p4)
}
 0x460   :  { %s4305_s30 = scalar_lea.hbm %s5696_s7, 32 }
 0x461   :  { %p4306_p5 = scmp.ne.s32.totalorder %s5696_s7, %s4305_s30  ;;  %p4309_p6 = scmp.lt.u32.totalorder %s4305_s30, %s5696_s7 }
 0x463   :  { %p4311_p7 = pnand %p4309_p6, %p4306_p5 }
 0x465   :  { %4314 = shalt.err (!%p4311_p7)
}
 0x466   :  { %3335 = dma.vmem_to_hbm [thread:$0]  %s3333_s1, 32, %s5696_s7, [#allocation3]  }
 0x467   :  { %4315 = dma.done.wait [#allocation3], 32  }
 0x468   :  { %4316 = vsyncadd [#allocation3], 4294967264 }
 0x469   :  { %3339 = vsyncpa [#allocation3], 1 }

</bundles_post_ra>
